<compile_context>
chip_gen: v5e
topology: v5e:2x2
jax: 0.10.0
libtpu: 0.0.40
codegen_flags: <defaults>
</compile_context>

<pallas_src>
import jax
import jax.numpy as jnp
from jax.experimental import pallas as pl
from jax.experimental.pallas import tpu as pltpu

# ----------------------------------------------------------------------------
# Config (small synthetic shapes)
# ----------------------------------------------------------------------------
BATCH = 2
C_IN = 4
IMG = 16          # full image is IMG x IMG; DiFull crop (scale=2) is 8 x 8
SCALE = 2
CROP = IMG // SCALE           # 8
HW = CROP * CROP              # 64 positions per crop
C1 = 16
C2 = 32
NUM_CLASSES = 10
NPAD = 128                    # lane-dense padded logit width (>= NUM_CLASSES)


# ----------------------------------------------------------------------------
# utils.get_augmentation_range equivalent (NCHW shape)
# ----------------------------------------------------------------------------
def get_augmentation_range(shape, scale, head_idx):
    height = shape[2] // scale
    width = shape[3] // scale
    y = (head_idx // scale) * height
    x = (head_idx % scale) * width
    return y, x, height, width


# ----------------------------------------------------------------------------
# Fused Pallas kernel: crop tile -> conv1+ReLU -> conv2+ReLU -> pool -> fc
# ----------------------------------------------------------------------------
def _difull_fused_kernel(x_ref, w1_ref, b1_ref, w2_ref, b2_ref,
                         wfc_ref, bfc_ref, o_ref, xpad_ref, f1pad_ref):
    B, H, W = BATCH, CROP, CROP
    M = B * H * W  # 128 rows feeding the MXU

    # ---- conv1: 3x3 SAME + bias + ReLU, as 9 shifted-slice MXU matmuls ----
    xpad_ref[...] = jnp.zeros_like(xpad_ref)
    xpad_ref[:, 1:H + 1, 1:W + 1, :] = x_ref[...]
    xp = xpad_ref[...]                                    # (B, H+2, W+2, C_IN)
    acc1 = jnp.zeros((M, C1), jnp.float32)
    for t in range(9):
        dy, dx = t // 3, t % 3
        sl = xp[:, dy:dy + H, dx:dx + W, :].reshape(M, C_IN)
        acc1 = acc1 + jnp.dot(sl, w1_ref[t], preferred_element_type=jnp.float32)
    f1 = jnp.maximum(acc1 + b1_ref[...], 0.0)             # (M, C1)

    # ---- conv2: same pattern on the VMEM-resident f1 ----
    f1pad_ref[...] = jnp.zeros_like(f1pad_ref)
    f1pad_ref[:, 1:H + 1, 1:W + 1, :] = f1.reshape(B, H, W, C1)
    fp = f1pad_ref[...]                                   # (B, H+2, W+2, C1)
    acc2 = jnp.zeros((M, C2), jnp.float32)
    for t in range(9):
        dy, dx = t // 3, t % 3
        sl = fp[:, dy:dy + H, dx:dx + W, :].reshape(M, C1)
        acc2 = acc2 + jnp.dot(sl, w2_ref[t], preferred_element_type=jnp.float32)
    f2 = jnp.maximum(acc2 + b2_ref[...], 0.0)             # (M, C2)

    # ---- global average pool + classifier head (1/HW folded into wfc) ----
    pooled = f2.reshape(B, H * W, C2).sum(axis=1)         # (B, C2)
    logits = jnp.dot(pooled, wfc_ref[...], preferred_element_type=jnp.float32)
    o_ref[0] = (logits + bfc_ref[...]).astype(o_ref.dtype)   # lane-dense (B, 128)


def _pack_params(params):
    """Reshape weights to kernel layout; fold pooling mean into fc; pad fc to 128 lanes."""
    w1 = params["w1"].reshape(9, C_IN, C1)                 # HWIO -> (tap, cin, cout)
    w2 = params["w2"].reshape(9, C1, C2)
    wfc = jnp.zeros((C2, NPAD), jnp.float32).at[:, :NUM_CLASSES].set(
        params["w_fc"] / float(HW))
    bfc = jnp.zeros((1, NPAD), jnp.float32).at[:, :NUM_CLASSES].set(params["b_fc"])
    return w1, params["b1"], w2, params["b2"], wfc, bfc


def _difull_pallas(params, x_nhwc, x_index_fn, out_index_fn, grid_size):
    B = x_nhwc.shape[0]
    w1, b1, w2, b2, wfc, bfc = _pack_params(params)
    out = pl.pallas_call(
        _difull_fused_kernel,
        out_shape=jax.ShapeDtypeStruct((grid_size, B, NPAD), jnp.float32),
        grid=(grid_size,),
        in_specs=[
            pl.BlockSpec((B, CROP, CROP, C_IN), x_index_fn),   # crop selected by index_map
            pl.BlockSpec((9, C_IN, C1), lambda g: (0, 0, 0)),
            pl.BlockSpec((1, C1), lambda g: (0, 0)),
            pl.BlockSpec((9, C1, C2), lambda g: (0, 0, 0)),
            pl.BlockSpec((1, C2), lambda g: (0, 0)),
            pl.BlockSpec((C2, NPAD), lambda g: (0, 0)),
            pl.BlockSpec((1, NPAD), lambda g: (0, 0)),
        ],
        out_specs=pl.BlockSpec((1, B, NPAD), out_index_fn),
        scratch_shapes=[
            pltpu.VMEM((B, CROP + 2, CROP + 2, C_IN), jnp.float32),  # padded crop
            pltpu.VMEM((B, CROP + 2, CROP + 2, C1), jnp.float32),    # padded f1
        ],
        compiler_params=pltpu.CompilerParams(
            dimension_semantics=("parallel",)),                 # head axis -> 2nd TC on v7x
    )(x_nhwc, w1, b1, w2, b2, wfc, bfc)
    return out[:, :, :NUM_CLASSES]


# ----------------------------------------------------------------------------
# DiFullContainer.forward
# ----------------------------------------------------------------------------
def difull_forward(params, x_nchw, output_head_idx=0, scale=SCALE):
    """Equivalent of DiFullContainer.forward(x, output_head_idx). Returns (B, NUM_CLASSES)."""
    assert scale == SCALE
    num_heads = scale * scale
    assert 0 <= output_head_idx < num_heads
    # TODO(synk): start_layer (resume from intermediate activations) is not modelled;
    # forward always starts from the input image (start_layer=None path).
    x_nhwc = jnp.transpose(x_nchw, (0, 2, 3, 1))            # NCHW -> NHWC (layout plumbing)
    hy, hx = output_head_idx // scale, output_head_idx % scale
    out = _difull_pallas(
        params, x_nhwc,
        x_index_fn=lambda g: (0, hy, hx, 0),
        out_index_fn=lambda g: (0, 0, 0),
        grid_size=1)
    return out[0]


def difull_forward_all_heads(params, x_nchw, scale=SCALE):
    """All scale*scale heads in one pallas_call. Returns (num_heads, B, NUM_CLASSES)."""
    assert scale == SCALE
    num_heads = scale * scale
    x_nhwc = jnp.transpose(x_nchw, (0, 2, 3, 1))
    return _difull_pallas(
        params, x_nhwc,
        x_index_fn=lambda g: (0, g // scale, g % scale, 0),
        out_index_fn=lambda g: (g, 0, 0),
        grid_size=num_heads)


# ----------------------------------------------------------------------------
# Pure-JAX reference for validation
# ----------------------------------------------------------------------------
def ref_forward(params, x_nchw, output_head_idx=0, scale=SCALE):
    y, xc, h, w = get_augmentation_range(x_nchw.shape, scale, output_head_idx)
    x = jnp.transpose(x_nchw[:, :, y:y + h, xc:xc + w], (0, 2, 3, 1))
    dn = ("NHWC", "HWIO", "NHWC")
    f = jax.lax.conv_general_dilated(x, params["w1"], (1, 1), "SAME",
                                     dimension_numbers=dn) + params["b1"]
    f = jnp.maximum(f, 0.0)
    f = jax.lax.conv_general_dilated(f, params["w2"], (1, 1), "SAME",
                                     dimension_numbers=dn) + params["b2"]
    f = jnp.maximum(f, 0.0)
    pooled = f.mean(axis=(1, 2))
    return pooled @ params["w_fc"] + params["b_fc"]


# ----------------------------------------------------------------------------
# Parameter init (deterministic, in-script)
# ----------------------------------------------------------------------------
def init_params(key):
    ks = jax.random.split(key, 6)
    return {
        "w1": jax.random.normal(ks[0], (3, 3, C_IN, C1), jnp.float32) * 0.1,   # HWIO
        "b1": jax.random.normal(ks[1], (1, C1), jnp.float32) * 0.1,
        "w2": jax.random.normal(ks[2], (3, 3, C1, C2), jnp.float32) * 0.1,     # HWIO
        "b2": jax.random.normal(ks[3], (1, C2), jnp.float32) * 0.1,
        "w_fc": jax.random.normal(ks[4], (C2, NUM_CLASSES), jnp.float32) * 0.1,
        "b_fc": jax.random.normal(ks[5], (1, NUM_CLASSES), jnp.float32) * 0.1,
    }


if __name__ == "__main__":
    key = jax.random.PRNGKey(0)
    pkey, xkey = jax.random.split(key)
    params = init_params(pkey)
    x = jax.random.normal(xkey, (BATCH, C_IN, IMG, IMG), jnp.float32)  # NCHW input

    # Single head (matches DiFullContainer.forward(x, output_head_idx=0))
    fwd = jax.jit(lambda p, a: difull_forward(p, a, output_head_idx=0))
    logits = jax.block_until_ready(fwd(params, x))
    assert logits.shape == (BATCH, NUM_CLASSES), logits.shape
    ref0 = jax.block_until_ready(ref_forward(params, x, output_head_idx=0))
    assert jnp.allclose(logits, ref0, atol=1e-4, rtol=1e-4), ("mismatch", logits, ref0)

    # All heads in one fused call (amortizes launch cost, uses both v7x TCs)
    fwd_all = jax.jit(difull_forward_all_heads)
    all_logits = jax.block_until_ready(fwd_all(params, x))
    assert all_logits.shape == (SCALE * SCALE, BATCH, NUM_CLASSES), all_logits.shape
    for h in range(SCALE * SCALE):
        refh = ref_forward(params, x, output_head_idx=h)
        assert jnp.allclose(all_logits[h], refh, atol=1e-4, rtol=1e-4), ("head mismatch", h)

    print("KERNEL_OK")
</pallas_src>

<mosaic_0001>
module attributes {stable_mosaic.version = 11 : i64} {
  func.func @_difull_fused_kernel(%arg0: i32, %arg1: memref<2x8x8x4xf32, #tpu.memory_space<vmem>>, %arg2: memref<9x4x16xf32, #tpu.memory_space<vmem>>, %arg3: memref<1x16xf32, #tpu.memory_space<vmem>>, %arg4: memref<9x16x32xf32, #tpu.memory_space<vmem>>, %arg5: memref<1x32xf32, #tpu.memory_space<vmem>>, %arg6: memref<32x128xf32, #tpu.memory_space<vmem>>, %arg7: memref<1x128xf32, #tpu.memory_space<vmem>>, %arg8: memref<1x2x128xf32, #tpu.memory_space<vmem>>, %arg9: memref<2x10x10x4xf32, #tpu.memory_space<vmem>>, %arg10: memref<2x10x10x16xf32, #tpu.memory_space<vmem>>) attributes {dimension_semantics = [#tpu.dimension_semantics<parallel>], iteration_bounds = array<i64: 1>, scalar_prefetch = 0 : i64, scratch_operands = 2 : i64, tpu.core_type = #tpu.core_type<tc>, window_params = [{transform_indices = @transform_0, window_bounds = array<i64: 2, 8, 8, 4>}, {pipeline_mode = #tpu.pipeline_mode<synchronous>, transform_indices = @transform_1, window_bounds = array<i64: 9, 4, 16>}, {pipeline_mode = #tpu.pipeline_mode<synchronous>, transform_indices = @transform_2, window_bounds = array<i64: 1, 16>}, {pipeline_mode = #tpu.pipeline_mode<synchronous>, transform_indices = @transform_3, window_bounds = array<i64: 9, 16, 32>}, {pipeline_mode = #tpu.pipeline_mode<synchronous>, transform_indices = @transform_4, window_bounds = array<i64: 1, 32>}, {pipeline_mode = #tpu.pipeline_mode<synchronous>, transform_indices = @transform_5, window_bounds = array<i64: 32, 128>}, {pipeline_mode = #tpu.pipeline_mode<synchronous>, transform_indices = @transform_6, window_bounds = array<i64: 1, 128>}, {pipeline_mode = #tpu.pipeline_mode<synchronous>, transform_indices = @transform_7, window_bounds = array<i64: 1, 2, 128>}]} {
    %cst = arith.constant 0.000000e+00 : f32
    %0 = vector.broadcast %cst : f32 to vector<2x10x10x4xf32>
    %c0 = arith.constant 0 : index
    %c0_0 = arith.constant 0 : index
    %c0_1 = arith.constant 0 : index
    %c0_2 = arith.constant 0 : index
    %1 = vector.load %arg9[%c0, %c0_0, %c0_1, %c0_2] : memref<2x10x10x4xf32, #tpu.memory_space<vmem>>, vector<2x10x10x4xf32>
    tpu.vector_store %arg9[%c0, %c0_0, %c0_1, %c0_2], %0 {strides = array<i32>} : memref<2x10x10x4xf32, #tpu.memory_space<vmem>>, vector<2x10x10x4xf32>,
    %c0_3 = arith.constant 0 : index
    %c0_4 = arith.constant 0 : index
    %c0_5 = arith.constant 0 : index
    %c0_6 = arith.constant 0 : index
    %2 = vector.load %arg1[%c0_3, %c0_4, %c0_5, %c0_6] : memref<2x8x8x4xf32, #tpu.memory_space<vmem>>, vector<2x8x8x4xf32>
    %c0_7 = arith.constant 0 : index
    %c1 = arith.constant 1 : index
    %c1_8 = arith.constant 1 : index
    %c0_9 = arith.constant 0 : index
    %3 = vector.load %arg9[%c0_7, %c1, %c1_8, %c0_9] : memref<2x10x10x4xf32, #tpu.memory_space<vmem>>, vector<2x8x8x4xf32>
    tpu.vector_store %arg9[%c0_7, %c1, %c1_8, %c0_9], %2 {strides = array<i32>} : memref<2x10x10x4xf32, #tpu.memory_space<vmem>>, vector<2x8x8x4xf32>,
    %c0_10 = arith.constant 0 : index
    %c0_11 = arith.constant 0 : index
    %c0_12 = arith.constant 0 : index
    %c0_13 = arith.constant 0 : index
    %4 = vector.load %arg9[%c0_10, %c0_11, %c0_12, %c0_13] : memref<2x10x10x4xf32, #tpu.memory_space<vmem>>, vector<2x10x10x4xf32>
    %cst_14 = arith.constant 0.000000e+00 : f32
    %5 = vector.broadcast %cst_14 : f32 to vector<128x16xf32>
    %6 = vector.extract_strided_slice %4 {offsets = [0, 0, 0, 0], sizes = [2, 8, 8, 4], strides = [1, 1, 1, 1]} : vector<2x10x10x4xf32> to vector<2x8x8x4xf32>
    %7 = vector.shape_cast %6 : vector<2x8x8x4xf32> to vector<128x4xf32>
    %c0_15 = arith.constant 0 : index
    %c0_16 = arith.constant 0 : index
    %c0_17 = arith.constant 0 : index
    %8 = vector.load %arg2[%c0_15, %c0_16, %c0_17] : memref<9x4x16xf32, #tpu.memory_space<vmem>>, vector<1x4x16xf32>
    %9 = vector.shape_cast %8 : vector<1x4x16xf32> to vector<4x16xf32>
    %cst_18 = arith.constant dense<0.000000e+00> : vector<128x16xf32>
    %10 = tpu.matmul %7, %9, %cst_18 {dimension_numbers = #tpu.dot_dimension_numbers<[1], [0], [0], [1], [0, 0, 1, 1], [], []>} : vector<128x4xf32>, vector<4x16xf32>, vector<128x16xf32> -> vector<128x16xf32>
    %11 = arith.addf %5, %10 : vector<128x16xf32>
    %12 = vector.extract_strided_slice %4 {offsets = [0, 0, 1, 0], sizes = [2, 8, 8, 4], strides = [1, 1, 1, 1]} : vector<2x10x10x4xf32> to vector<2x8x8x4xf32>
    %13 = vector.shape_cast %12 : vector<2x8x8x4xf32> to vector<128x4xf32>
    %c1_19 = arith.constant 1 : index
    %c0_20 = arith.constant 0 : index
    %c0_21 = arith.constant 0 : index
    %14 = vector.load %arg2[%c1_19, %c0_20, %c0_21] : memref<9x4x16xf32, #tpu.memory_space<vmem>>, vector<1x4x16xf32>
    %15 = vector.shape_cast %14 : vector<1x4x16xf32> to vector<4x16xf32>
    %cst_22 = arith.constant dense<0.000000e+00> : vector<128x16xf32>
    %16 = tpu.matmul %13, %15, %cst_22 {dimension_numbers = #tpu.dot_dimension_numbers<[1], [0], [0], [1], [0, 0, 1, 1], [], []>} : vector<128x4xf32>, vector<4x16xf32>, vector<128x16xf32> -> vector<128x16xf32>
    %17 = arith.addf %11, %16 : vector<128x16xf32>
    %18 = vector.extract_strided_slice %4 {offsets = [0, 0, 2, 0], sizes = [2, 8, 8, 4], strides = [1, 1, 1, 1]} : vector<2x10x10x4xf32> to vector<2x8x8x4xf32>
    %19 = vector.shape_cast %18 : vector<2x8x8x4xf32> to vector<128x4xf32>
    %c2 = arith.constant 2 : index
    %c0_23 = arith.constant 0 : index
    %c0_24 = arith.constant 0 : index
    %20 = vector.load %arg2[%c2, %c0_23, %c0_24] : memref<9x4x16xf32, #tpu.memory_space<vmem>>, vector<1x4x16xf32>
    %21 = vector.shape_cast %20 : vector<1x4x16xf32> to vector<4x16xf32>
    %cst_25 = arith.constant dense<0.000000e+00> : vector<128x16xf32>
    %22 = tpu.matmul %19, %21, %cst_25 {dimension_numbers = #tpu.dot_dimension_numbers<[1], [0], [0], [1], [0, 0, 1, 1], [], []>} : vector<128x4xf32>, vector<4x16xf32>, vector<128x16xf32> -> vector<128x16xf32>
    %23 = arith.addf %17, %22 : vector<128x16xf32>
    %24 = vector.extract_strided_slice %4 {offsets = [0, 1, 0, 0], sizes = [2, 8, 8, 4], strides = [1, 1, 1, 1]} : vector<2x10x10x4xf32> to vector<2x8x8x4xf32>
    %25 = vector.shape_cast %24 : vector<2x8x8x4xf32> to vector<128x4xf32>
    %c3 = arith.constant 3 : index
    %c0_26 = arith.constant 0 : index
    %c0_27 = arith.constant 0 : index
    %26 = vector.load %arg2[%c3, %c0_26, %c0_27] : memref<9x4x16xf32, #tpu.memory_space<vmem>>, vector<1x4x16xf32>
    %27 = vector.shape_cast %26 : vector<1x4x16xf32> to vector<4x16xf32>
    %cst_28 = arith.constant dense<0.000000e+00> : vector<128x16xf32>
    %28 = tpu.matmul %25, %27, %cst_28 {dimension_numbers = #tpu.dot_dimension_numbers<[1], [0], [0], [1], [0, 0, 1, 1], [], []>} : vector<128x4xf32>, vector<4x16xf32>, vector<128x16xf32> -> vector<128x16xf32>
    %29 = arith.addf %23, %28 : vector<128x16xf32>
    %30 = vector.extract_strided_slice %4 {offsets = [0, 1, 1, 0], sizes = [2, 8, 8, 4], strides = [1, 1, 1, 1]} : vector<2x10x10x4xf32> to vector<2x8x8x4xf32>
    %31 = vector.shape_cast %30 : vector<2x8x8x4xf32> to vector<128x4xf32>
    %c4 = arith.constant 4 : index
    %c0_29 = arith.constant 0 : index
    %c0_30 = arith.constant 0 : index
    %32 = vector.load %arg2[%c4, %c0_29, %c0_30] : memref<9x4x16xf32, #tpu.memory_space<vmem>>, vector<1x4x16xf32>
    %33 = vector.shape_cast %32 : vector<1x4x16xf32> to vector<4x16xf32>
    %cst_31 = arith.constant dense<0.000000e+00> : vector<128x16xf32>
    %34 = tpu.matmul %31, %33, %cst_31 {dimension_numbers = #tpu.dot_dimension_numbers<[1], [0], [0], [1], [0, 0, 1, 1], [], []>} : vector<128x4xf32>, vector<4x16xf32>, vector<128x16xf32> -> vector<128x16xf32>
    %35 = arith.addf %29, %34 : vector<128x16xf32>
    %36 = vector.extract_strided_slice %4 {offsets = [0, 1, 2, 0], sizes = [2, 8, 8, 4], strides = [1, 1, 1, 1]} : vector<2x10x10x4xf32> to vector<2x8x8x4xf32>
    %37 = vector.shape_cast %36 : vector<2x8x8x4xf32> to vector<128x4xf32>
    %c5 = arith.constant 5 : index
    %c0_32 = arith.constant 0 : index
    %c0_33 = arith.constant 0 : index
    %38 = vector.load %arg2[%c5, %c0_32, %c0_33] : memref<9x4x16xf32, #tpu.memory_space<vmem>>, vector<1x4x16xf32>
    %39 = vector.shape_cast %38 : vector<1x4x16xf32> to vector<4x16xf32>
    %cst_34 = arith.constant dense<0.000000e+00> : vector<128x16xf32>
    %40 = tpu.matmul %37, %39, %cst_34 {dimension_numbers = #tpu.dot_dimension_numbers<[1], [0], [0], [1], [0, 0, 1, 1], [], []>} : vector<128x4xf32>, vector<4x16xf32>, vector<128x16xf32> -> vector<128x16xf32>
    %41 = arith.addf %35, %40 : vector<128x16xf32>
    %42 = vector.extract_strided_slice %4 {offsets = [0, 2, 0, 0], sizes = [2, 8, 8, 4], strides = [1, 1, 1, 1]} : vector<2x10x10x4xf32> to vector<2x8x8x4xf32>
    %43 = vector.shape_cast %42 : vector<2x8x8x4xf32> to vector<128x4xf32>
    %c6 = arith.constant 6 : index
    %c0_35 = arith.constant 0 : index
    %c0_36 = arith.constant 0 : index
    %44 = vector.load %arg2[%c6, %c0_35, %c0_36] : memref<9x4x16xf32, #tpu.memory_space<vmem>>, vector<1x4x16xf32>
    %45 = vector.shape_cast %44 : vector<1x4x16xf32> to vector<4x16xf32>
    %cst_37 = arith.constant dense<0.000000e+00> : vector<128x16xf32>
    %46 = tpu.matmul %43, %45, %cst_37 {dimension_numbers = #tpu.dot_dimension_numbers<[1], [0], [0], [1], [0, 0, 1, 1], [], []>} : vector<128x4xf32>, vector<4x16xf32>, vector<128x16xf32> -> vector<128x16xf32>
    %47 = arith.addf %41, %46 : vector<128x16xf32>
    %48 = vector.extract_strided_slice %4 {offsets = [0, 2, 1, 0], sizes = [2, 8, 8, 4], strides = [1, 1, 1, 1]} : vector<2x10x10x4xf32> to vector<2x8x8x4xf32>
    %49 = vector.shape_cast %48 : vector<2x8x8x4xf32> to vector<128x4xf32>
    %c7 = arith.constant 7 : index
    %c0_38 = arith.constant 0 : index
    %c0_39 = arith.constant 0 : index
    %50 = vector.load %arg2[%c7, %c0_38, %c0_39] : memref<9x4x16xf32, #tpu.memory_space<vmem>>, vector<1x4x16xf32>
    %51 = vector.shape_cast %50 : vector<1x4x16xf32> to vector<4x16xf32>
    %cst_40 = arith.constant dense<0.000000e+00> : vector<128x16xf32>
    %52 = tpu.matmul %49, %51, %cst_40 {dimension_numbers = #tpu.dot_dimension_numbers<[1], [0], [0], [1], [0, 0, 1, 1], [], []>} : vector<128x4xf32>, vector<4x16xf32>, vector<128x16xf32> -> vector<128x16xf32>
    %53 = arith.addf %47, %52 : vector<128x16xf32>
    %54 = vector.extract_strided_slice %4 {offsets = [0, 2, 2, 0], sizes = [2, 8, 8, 4], strides = [1, 1, 1, 1]} : vector<2x10x10x4xf32> to vector<2x8x8x4xf32>
    %55 = vector.shape_cast %54 : vector<2x8x8x4xf32> to vector<128x4xf32>
    %c8 = arith.constant 8 : index
    %c0_41 = arith.constant 0 : index
    %c0_42 = arith.constant 0 : index
    %56 = vector.load %arg2[%c8, %c0_41, %c0_42] : memref<9x4x16xf32, #tpu.memory_space<vmem>>, vector<1x4x16xf32>
    %57 = vector.shape_cast %56 : vector<1x4x16xf32> to vector<4x16xf32>
    %cst_43 = arith.constant dense<0.000000e+00> : vector<128x16xf32>
    %58 = tpu.matmul %55, %57, %cst_43 {dimension_numbers = #tpu.dot_dimension_numbers<[1], [0], [0], [1], [0, 0, 1, 1], [], []>} : vector<128x4xf32>, vector<4x16xf32>, vector<128x16xf32> -> vector<128x16xf32>
    %59 = arith.addf %53, %58 : vector<128x16xf32>
    %c0_44 = arith.constant 0 : index
    %c0_45 = arith.constant 0 : index
    %60 = vector.load %arg3[%c0_44, %c0_45] : memref<1x16xf32, #tpu.memory_space<vmem>>, vector<1x16xf32>
    %61 = vector.broadcast %60 : vector<1x16xf32> to vector<128x16xf32>
    %62 = arith.addf %59, %61 : vector<128x16xf32>
    %cst_46 = arith.constant 0.000000e+00 : f32
    %63 = vector.broadcast %cst_46 : f32 to vector<128x16xf32>
    %64 = arith.maximumf %62, %63 : vector<128x16xf32>
    %cst_47 = arith.constant 0.000000e+00 : f32
    %65 = vector.broadcast %cst_47 : f32 to vector<2x10x10x16xf32>
    %c0_48 = arith.constant 0 : index
    %c0_49 = arith.constant 0 : index
    %c0_50 = arith.constant 0 : index
    %c0_51 = arith.constant 0 : index
    %66 = vector.load %arg10[%c0_48, %c0_49, %c0_50, %c0_51] : memref<2x10x10x16xf32, #tpu.memory_space<vmem>>, vector<2x10x10x16xf32>
    tpu.vector_store %arg10[%c0_48, %c0_49, %c0_50, %c0_51], %65 {strides = array<i32>} : memref<2x10x10x16xf32, #tpu.memory_space<vmem>>, vector<2x10x10x16xf32>,
    %67 = vector.shape_cast %64 : vector<128x16xf32> to vector<2x8x8x16xf32>
    %c0_52 = arith.constant 0 : index
    %c1_53 = arith.constant 1 : index
    %c1_54 = arith.constant 1 : index
    %c0_55 = arith.constant 0 : index
    %68 = vector.load %arg10[%c0_52, %c1_53, %c1_54, %c0_55] : memref<2x10x10x16xf32, #tpu.memory_space<vmem>>, vector<2x8x8x16xf32>
    tpu.vector_store %arg10[%c0_52, %c1_53, %c1_54, %c0_55], %67 {strides = array<i32>} : memref<2x10x10x16xf32, #tpu.memory_space<vmem>>, vector<2x8x8x16xf32>,
    %c0_56 = arith.constant 0 : index
    %c0_57 = arith.constant 0 : index
    %c0_58 = arith.constant 0 : index
    %c0_59 = arith.constant 0 : index
    %69 = vector.load %arg10[%c0_56, %c0_57, %c0_58, %c0_59] : memref<2x10x10x16xf32, #tpu.memory_space<vmem>>, vector<2x10x10x16xf32>
    %cst_60 = arith.constant 0.000000e+00 : f32
    %70 = vector.broadcast %cst_60 : f32 to vector<128x32xf32>
    %71 = vector.extract_strided_slice %69 {offsets = [0, 0, 0, 0], sizes = [2, 8, 8, 16], strides = [1, 1, 1, 1]} : vector<2x10x10x16xf32> to vector<2x8x8x16xf32>
    %72 = vector.shape_cast %71 : vector<2x8x8x16xf32> to vector<128x16xf32>
    %c0_61 = arith.constant 0 : index
    %c0_62 = arith.constant 0 : index
    %c0_63 = arith.constant 0 : index
    %73 = vector.load %arg4[%c0_61, %c0_62, %c0_63] : memref<9x16x32xf32, #tpu.memory_space<vmem>>, vector<1x16x32xf32>
    %74 = vector.shape_cast %73 : vector<1x16x32xf32> to vector<16x32xf32>
    %cst_64 = arith.constant dense<0.000000e+00> : vector<128x32xf32>
    %75 = tpu.matmul %72, %74, %cst_64 {dimension_numbers = #tpu.dot_dimension_numbers<[1], [0], [0], [1], [0, 0, 1, 1], [], []>} : vector<128x16xf32>, vector<16x32xf32>, vector<128x32xf32> -> vector<128x32xf32>
    %76 = arith.addf %70, %75 : vector<128x32xf32>
    %77 = vector.extract_strided_slice %69 {offsets = [0, 0, 1, 0], sizes = [2, 8, 8, 16], strides = [1, 1, 1, 1]} : vector<2x10x10x16xf32> to vector<2x8x8x16xf32>
    %78 = vector.shape_cast %77 : vector<2x8x8x16xf32> to vector<128x16xf32>
    %c1_65 = arith.constant 1 : index
    %c0_66 = arith.constant 0 : index
    %c0_67 = arith.constant 0 : index
    %79 = vector.load %arg4[%c1_65, %c0_66, %c0_67] : memref<9x16x32xf32, #tpu.memory_space<vmem>>, vector<1x16x32xf32>
    %80 = vector.shape_cast %79 : vector<1x16x32xf32> to vector<16x32xf32>
    %cst_68 = arith.constant dense<0.000000e+00> : vector<128x32xf32>
    %81 = tpu.matmul %78, %80, %cst_68 {dimension_numbers = #tpu.dot_dimension_numbers<[1], [0], [0], [1], [0, 0, 1, 1], [], []>} : vector<128x16xf32>, vector<16x32xf32>, vector<128x32xf32> -> vector<128x32xf32>
    %82 = arith.addf %76, %81 : vector<128x32xf32>
    %83 = vector.extract_strided_slice %69 {offsets = [0, 0, 2, 0], sizes = [2, 8, 8, 16], strides = [1, 1, 1, 1]} : vector<2x10x10x16xf32> to vector<2x8x8x16xf32>
    %84 = vector.shape_cast %83 : vector<2x8x8x16xf32> to vector<128x16xf32>
    %c2_69 = arith.constant 2 : index
    %c0_70 = arith.constant 0 : index
    %c0_71 = arith.constant 0 : index
    %85 = vector.load %arg4[%c2_69, %c0_70, %c0_71] : memref<9x16x32xf32, #tpu.memory_space<vmem>>, vector<1x16x32xf32>
    %86 = vector.shape_cast %85 : vector<1x16x32xf32> to vector<16x32xf32>
    %cst_72 = arith.constant dense<0.000000e+00> : vector<128x32xf32>
    %87 = tpu.matmul %84, %86, %cst_72 {dimension_numbers = #tpu.dot_dimension_numbers<[1], [0], [0], [1], [0, 0, 1, 1], [], []>} : vector<128x16xf32>, vector<16x32xf32>, vector<128x32xf32> -> vector<128x32xf32>
    %88 = arith.addf %82, %87 : vector<128x32xf32>
    %89 = vector.extract_strided_slice %69 {offsets = [0, 1, 0, 0], sizes = [2, 8, 8, 16], strides = [1, 1, 1, 1]} : vector<2x10x10x16xf32> to vector<2x8x8x16xf32>
    %90 = vector.shape_cast %89 : vector<2x8x8x16xf32> to vector<128x16xf32>
    %c3_73 = arith.constant 3 : index
    %c0_74 = arith.constant 0 : index
    %c0_75 = arith.constant 0 : index
    %91 = vector.load %arg4[%c3_73, %c0_74, %c0_75] : memref<9x16x32xf32, #tpu.memory_space<vmem>>, vector<1x16x32xf32>
    %92 = vector.shape_cast %91 : vector<1x16x32xf32> to vector<16x32xf32>
    %cst_76 = arith.constant dense<0.000000e+00> : vector<128x32xf32>
    %93 = tpu.matmul %90, %92, %cst_76 {dimension_numbers = #tpu.dot_dimension_numbers<[1], [0], [0], [1], [0, 0, 1, 1], [], []>} : vector<128x16xf32>, vector<16x32xf32>, vector<128x32xf32> -> vector<128x32xf32>
    %94 = arith.addf %88, %93 : vector<128x32xf32>
    %95 = vector.extract_strided_slice %69 {offsets = [0, 1, 1, 0], sizes = [2, 8, 8, 16], strides = [1, 1, 1, 1]} : vector<2x10x10x16xf32> to vector<2x8x8x16xf32>
    %96 = vector.shape_cast %95 : vector<2x8x8x16xf32> to vector<128x16xf32>
    %c4_77 = arith.constant 4 : index
    %c0_78 = arith.constant 0 : index
    %c0_79 = arith.constant 0 : index
    %97 = vector.load %arg4[%c4_77, %c0_78, %c0_79] : memref<9x16x32xf32, #tpu.memory_space<vmem>>, vector<1x16x32xf32>
    %98 = vector.shape_cast %97 : vector<1x16x32xf32> to vector<16x32xf32>
    %cst_80 = arith.constant dense<0.000000e+00> : vector<128x32xf32>
    %99 = tpu.matmul %96, %98, %cst_80 {dimension_numbers = #tpu.dot_dimension_numbers<[1], [0], [0], [1], [0, 0, 1, 1], [], []>} : vector<128x16xf32>, vector<16x32xf32>, vector<128x32xf32> -> vector<128x32xf32>
    %100 = arith.addf %94, %99 : vector<128x32xf32>
    %101 = vector.extract_strided_slice %69 {offsets = [0, 1, 2, 0], sizes = [2, 8, 8, 16], strides = [1, 1, 1, 1]} : vector<2x10x10x16xf32> to vector<2x8x8x16xf32>
    %102 = vector.shape_cast %101 : vector<2x8x8x16xf32> to vector<128x16xf32>
    %c5_81 = arith.constant 5 : index
    %c0_82 = arith.constant 0 : index
    %c0_83 = arith.constant 0 : index
    %103 = vector.load %arg4[%c5_81, %c0_82, %c0_83] : memref<9x16x32xf32, #tpu.memory_space<vmem>>, vector<1x16x32xf32>
    %104 = vector.shape_cast %103 : vector<1x16x32xf32> to vector<16x32xf32>
    %cst_84 = arith.constant dense<0.000000e+00> : vector<128x32xf32>
    %105 = tpu.matmul %102, %104, %cst_84 {dimension_numbers = #tpu.dot_dimension_numbers<[1], [0], [0], [1], [0, 0, 1, 1], [], []>} : vector<128x16xf32>, vector<16x32xf32>, vector<128x32xf32> -> vector<128x32xf32>
    %106 = arith.addf %100, %105 : vector<128x32xf32>
    %107 = vector.extract_strided_slice %69 {offsets = [0, 2, 0, 0], sizes = [2, 8, 8, 16], strides = [1, 1, 1, 1]} : vector<2x10x10x16xf32> to vector<2x8x8x16xf32>
    %108 = vector.shape_cast %107 : vector<2x8x8x16xf32> to vector<128x16xf32>
    %c6_85 = arith.constant 6 : index
    %c0_86 = arith.constant 0 : index
    %c0_87 = arith.constant 0 : index
    %109 = vector.load %arg4[%c6_85, %c0_86, %c0_87] : memref<9x16x32xf32, #tpu.memory_space<vmem>>, vector<1x16x32xf32>
    %110 = vector.shape_cast %109 : vector<1x16x32xf32> to vector<16x32xf32>
    %cst_88 = arith.constant dense<0.000000e+00> : vector<128x32xf32>
    %111 = tpu.matmul %108, %110, %cst_88 {dimension_numbers = #tpu.dot_dimension_numbers<[1], [0], [0], [1], [0, 0, 1, 1], [], []>} : vector<128x16xf32>, vector<16x32xf32>, vector<128x32xf32> -> vector<128x32xf32>
    %112 = arith.addf %106, %111 : vector<128x32xf32>
    %113 = vector.extract_strided_slice %69 {offsets = [0, 2, 1, 0], sizes = [2, 8, 8, 16], strides = [1, 1, 1, 1]} : vector<2x10x10x16xf32> to vector<2x8x8x16xf32>
    %114 = vector.shape_cast %113 : vector<2x8x8x16xf32> to vector<128x16xf32>
    %c7_89 = arith.constant 7 : index
    %c0_90 = arith.constant 0 : index
    %c0_91 = arith.constant 0 : index
    %115 = vector.load %arg4[%c7_89, %c0_90, %c0_91] : memref<9x16x32xf32, #tpu.memory_space<vmem>>, vector<1x16x32xf32>
    %116 = vector.shape_cast %115 : vector<1x16x32xf32> to vector<16x32xf32>
    %cst_92 = arith.constant dense<0.000000e+00> : vector<128x32xf32>
    %117 = tpu.matmul %114, %116, %cst_92 {dimension_numbers = #tpu.dot_dimension_numbers<[1], [0], [0], [1], [0, 0, 1, 1], [], []>} : vector<128x16xf32>, vector<16x32xf32>, vector<128x32xf32> -> vector<128x32xf32>
    %118 = arith.addf %112, %117 : vector<128x32xf32>
    %119 = vector.extract_strided_slice %69 {offsets = [0, 2, 2, 0], sizes = [2, 8, 8, 16], strides = [1, 1, 1, 1]} : vector<2x10x10x16xf32> to vector<2x8x8x16xf32>
    %120 = vector.shape_cast %119 : vector<2x8x8x16xf32> to vector<128x16xf32>
    %c8_93 = arith.constant 8 : index
    %c0_94 = arith.constant 0 : index
    %c0_95 = arith.constant 0 : index
    %121 = vector.load %arg4[%c8_93, %c0_94, %c0_95] : memref<9x16x32xf32, #tpu.memory_space<vmem>>, vector<1x16x32xf32>
    %122 = vector.shape_cast %121 : vector<1x16x32xf32> to vector<16x32xf32>
    %cst_96 = arith.constant dense<0.000000e+00> : vector<128x32xf32>
    %123 = tpu.matmul %120, %122, %cst_96 {dimension_numbers = #tpu.dot_dimension_numbers<[1], [0], [0], [1], [0, 0, 1, 1], [], []>} : vector<128x16xf32>, vector<16x32xf32>, vector<128x32xf32> -> vector<128x32xf32>
    %124 = arith.addf %118, %123 : vector<128x32xf32>
    %c0_97 = arith.constant 0 : index
    %c0_98 = arith.constant 0 : index
    %125 = vector.load %arg5[%c0_97, %c0_98] : memref<1x32xf32, #tpu.memory_space<vmem>>, vector<1x32xf32>
    %126 = vector.broadcast %125 : vector<1x32xf32> to vector<128x32xf32>
    %127 = arith.addf %124, %126 : vector<128x32xf32>
    %cst_99 = arith.constant 0.000000e+00 : f32
    %128 = vector.broadcast %cst_99 : f32 to vector<128x32xf32>
    %129 = arith.maximumf %127, %128 : vector<128x32xf32>
    %130 = vector.shape_cast %129 : vector<128x32xf32> to vector<2x64x32xf32>
    %cst_100 = arith.constant dense<0.000000e+00> : vector<2x32xf32>
    %131 = vector.multi_reduction <add>, %130, %cst_100 [1] : vector<2x64x32xf32> to vector<2x32xf32>
    %c0_101 = arith.constant 0 : index
    %c0_102 = arith.constant 0 : index
    %132 = vector.load %arg6[%c0_101, %c0_102] : memref<32x128xf32, #tpu.memory_space<vmem>>, vector<32x128xf32>
    %cst_103 = arith.constant dense<0.000000e+00> : vector<2x128xf32>
    %133 = tpu.matmul %131, %132, %cst_103 {dimension_numbers = #tpu.dot_dimension_numbers<[1], [0], [0], [1], [0, 0, 1, 1], [], []>} : vector<2x32xf32>, vector<32x128xf32>, vector<2x128xf32> -> vector<2x128xf32>
    %c0_104 = arith.constant 0 : index
    %c0_105 = arith.constant 0 : index
    %134 = vector.load %arg7[%c0_104, %c0_105] : memref<1x128xf32, #tpu.memory_space<vmem>>, vector<1x128xf32>
    %135 = vector.broadcast %134 : vector<1x128xf32> to vector<2x128xf32>
    %136 = arith.addf %133, %135 : vector<2x128xf32>
    %c0_106 = arith.constant 0 : index
    %c0_107 = arith.constant 0 : index
    %c0_108 = arith.constant 0 : index
    %137 = vector.load %arg8[%c0_106, %c0_107, %c0_108] : memref<1x2x128xf32, #tpu.memory_space<vmem>>, vector<1x2x128xf32>
    %138 = vector.shape_cast %137 : vector<1x2x128xf32> to vector<2x128xf32>
    %139 = vector.shape_cast %136 : vector<2x128xf32> to vector<1x2x128xf32>
    tpu.vector_store %arg8[%c0_106, %c0_107, %c0_108], %139 {strides = array<i32>} : memref<1x2x128xf32, #tpu.memory_space<vmem>>, vector<1x2x128xf32>,
    return
  }
  func.func @transform_0(%arg0: i32) -> (i32, i32, i32, i32) {
    %c0_i32 = arith.constant 0 : i32
    %c0_i32_0 = arith.constant 0 : i32
    %c0_i32_1 = arith.constant 0 : i32
    %c0_i32_2 = arith.constant 0 : i32
    %c0_i32_3 = arith.constant 0 : i32
    return %c0_i32, %c0_i32_0, %c0_i32_1, %c0_i32_2 : i32, i32, i32, i32
  }
  func.func @transform_1(%arg0: i32) -> (i32, i32, i32) {
    %c0_i32 = arith.constant 0 : i32
    %c0_i32_0 = arith.constant 0 : i32
    %c0_i32_1 = arith.constant 0 : i32
    %c0_i32_2 = arith.constant 0 : i32
    return %c0_i32, %c0_i32_0, %c0_i32_1 : i32, i32, i32
  }
  func.func @transform_2(%arg0: i32) -> (i32, i32) {
    %c0_i32 = arith.constant 0 : i32
    %c0_i32_0 = arith.constant 0 : i32
    %c0_i32_1 = arith.constant 0 : i32
    return %c0_i32, %c0_i32_0 : i32, i32
  }
  func.func @transform_3(%arg0: i32) -> (i32, i32, i32) {
    %c0_i32 = arith.constant 0 : i32
    %c0_i32_0 = arith.constant 0 : i32
    %c0_i32_1 = arith.constant 0 : i32
    %c0_i32_2 = arith.constant 0 : i32
    return %c0_i32, %c0_i32_0, %c0_i32_1 : i32, i32, i32
  }
  func.func @transform_4(%arg0: i32) -> (i32, i32) {
    %c0_i32 = arith.constant 0 : i32
    %c0_i32_0 = arith.constant 0 : i32
    %c0_i32_1 = arith.constant 0 : i32
    return %c0_i32, %c0_i32_0 : i32, i32
  }
  func.func @transform_5(%arg0: i32) -> (i32, i32) {
    %c0_i32 = arith.constant 0 : i32
    %c0_i32_0 = arith.constant 0 : i32
    %c0_i32_1 = arith.constant 0 : i32
    return %c0_i32, %c0_i32_0 : i32, i32
  }
  func.func @transform_6(%arg0: i32) -> (i32, i32) {
    %c0_i32 = arith.constant 0 : i32
    %c0_i32_0 = arith.constant 0 : i32
    %c0_i32_1 = arith.constant 0 : i32
    return %c0_i32, %c0_i32_0 : i32, i32
  }
  func.func @transform_7(%arg0: i32) -> (i32, i32, i32) {
    %c0_i32 = arith.constant 0 : i32
    %c0_i32_0 = arith.constant 0 : i32
    %c0_i32_1 = arith.constant 0 : i32
    %c0_i32_2 = arith.constant 0 : i32
    return %c0_i32, %c0_i32_0, %c0_i32_1 : i32, i32, i32
  }
}

</mosaic_0001>

<bundles_post_ra>
// kernel: _lambda_.1
= control target key start
LH: loop header
LB: loop body
LE: loop exit
PB: predicated region body
PF: predicated region fallthrough
CT: control target
= control target key end

     0   :  { %vm352_vm0 = vcmask 1043456   ;;  %vm121_vm1 = vcmask 31744   ;;  %vm123_vm2 = vcmask 25600   ;;  %v4550_v2 = vmov 0.0   ;;  %s4542_s0 = inlined_call_operand.vmem [shape: f32[2,16,16,4], index: 0, kind: input, shape index: {}]   ;;  %s4543_s1 = inlined_call_operand.vmem [shape: f32[9,4,16], index: 1, kind: input, shape index: {}]   ;;  %s4544_s2 = inlined_call_operand.vmem [shape: f32[1,16], index: 2, kind: input, shape index: {}]   ;;  %s4545_s3 = inlined_call_operand.vmem [shape: f32[9,16,32], index: 3, kind: input, shape index: {}]   ;;  %s4546_s4 = inlined_call_operand.vmem [shape: f32[1,32], index: 4, kind: input, shape index: {}]   ;;  %s4547_s5 = inlined_call_operand.vmem [shape: f32[32,128], index: 5, kind: input, shape index: {}]   ;;  %s4548_s6 = inlined_call_operand.vmem [shape: f32[1,128], index: 6, kind: input, shape index: {}]   ;;  %s4549_s7 = inlined_call_operand.vmem [shape: f32[1,2,128], index: 7, kind: output, shape index: {}]  }
   0x1   :  { %v236_v0 = vld [vmem:[%s4543_s1] sm:$0xf]  ;;  %145 = vst.msk [vmem:[#allocation2 + $0xb0] sm:$0xff] %vm121_vm1, %v4550_v2  ;;  %v2520_v3 = vld [vmem:[%s4543_s1 + $0x4] sm:$0xf]  ;;  %vm269_vm3 = vcmask 1046528  }
   0x2   :  { %v88_v1 = vld [vmem:[%s4542_s0 + $0x100] sm:$0xff]  ;;  %2843 = vmatpush.msk.msra.mxu2 %vm352_vm0, %v236_v0  ;;  %2538 = vmatpush.msk.msra.mxu1 %vm352_vm0, %v236_v0  ;;  %146 = vst.msk [vmem:[#allocation2 + $0xb8] sm:$0x3] %vm123_vm2, %v4550_v2  ;;  %v2591_v4 = vld [vmem:[%s4543_s1 + $0x10] sm:$0xf]  ;;  %vm521_vm4 = vcmask 1045504  }
   0x3   :  { %2521 = vmatpush.msk.msra.mxu0 %vm352_vm0, %v2520_v3  ;;  %2842 = vmatpush.msk.msra.mxu3 %vm352_vm0, %v2520_v3  ;;  %188 = vst.msk [vmem:[#allocation2 + $0xb1] sm:$0xff] %vm121_vm1, %v88_v1  ;;  %v2555_v15 = vld [vmem:[%s4543_s1 + $0x8] sm:$0xf]  ;;  %v2573_v16 = vld [vmem:[%s4543_s1 + $0xc] sm:$0xf]  ;;  %v90_v17 = vld [vmem:[%s4542_s0 + $0x110] sm:$0xff] }
   0x4   :  { %122 = vst.msk [vmem:[#allocation2] sm:$0xff] %vm121_vm1, %v4550_v2  ;;  %2556 = vmatpush.msk.msrb.mxu2 %vm352_vm0, %v2555_v15  ;;  %v72_v18 = vld [vmem:[%s4542_s0] sm:$0xff]  ;;  %v74_v20 = vld [vmem:[%s4542_s0 + $0x10] sm:$0xff]  ;;  %vm1296_vm5 = vcmask 130048   ;;  %vm1298_vm6 = vcmask 123904   ;;  %vm2434_vm7 = vcmask 261120  }
   0x5   :  { %124 = vst.msk [vmem:[#allocation2 + $0x8] sm:$0x3] %vm123_vm2, %v4550_v2  ;;  %2592 = vmatpush.msk.msrb.mxu0 %vm352_vm0, %v2591_v4  ;;  %2574 = vmatpush.msk.msrb.mxu3 %vm352_vm0, %v2573_v16  ;;  %v92_v19 = vld [vmem:[%s4542_s0 + $0x120] sm:$0xff]  ;;  %v94_v21 = vld [vmem:[%s4542_s0 + $0x130] sm:$0xff]  ;;  %vm2487_vm8 = vcmask 1041409  }
   0x6   :  { %125 = vst.msk [vmem:[#allocation2 + $0x10] sm:$0xff] %vm121_vm1, %v4550_v2  ;;  %v76_v22 = vld [vmem:[%s4542_s0 + $0x20] sm:$0xff]  ;;  %v78_v24 = vld [vmem:[%s4542_s0 + $0x30] sm:$0xff] }
   0x7   :  { %126 = vst.msk [vmem:[#allocation2 + $0x18] sm:$0x3] %vm123_vm2, %v4550_v2  ;;  %v96_v23 = vld [vmem:[%s4542_s0 + $0x140] sm:$0xff]  ;;  %v98_v25 = vld [vmem:[%s4542_s0 + $0x150] sm:$0xff] }
   0x8   :  { %127 = vst.msk [vmem:[#allocation2 + $0x20] sm:$0xff] %vm121_vm1, %v4550_v2  ;;  %v80_v26 = vld [vmem:[%s4542_s0 + $0x40] sm:$0xff]  ;;  %v82_v44 = vld [vmem:[%s4542_s0 + $0x50] sm:$0xff] }
   0x9   :  { %128 = vst.msk [vmem:[#allocation2 + $0x28] sm:$0x3] %vm123_vm2, %v4550_v2  ;;  %v100_v40 = vld [vmem:[%s4542_s0 + $0x160] sm:$0xff] }
   0xa   :  { %v2922_v5 = vld [vmem:[#allocation2 + $0xb0] sm:$0xff]  ;;  %129 = vst.msk [vmem:[#allocation2 + $0x30] sm:$0xff] %vm121_vm1, %v4550_v2  ;;  %v2927_v6 = vld [vmem:[#allocation2 + $0xb8] sm:$0x3]  ;;  %v84_v49 = vld [vmem:[%s4542_s0 + $0x60] sm:$0xff] }
   0xb   :  { %2548 = vmatmul.msk.f32.vlgmr.msra.gmra.mxu2 %vm121_vm1, %v2922_v5  ;;  %130 = vst.msk [vmem:[#allocation2 + $0x38] sm:$0x3] %vm123_vm2, %v4550_v2  ;;  %v2933_v7 = vld [vmem:[#allocation2] sm:$0xff]  ;;  %v297_v8 = vrot.slane %v2922_v5, 1  ;;  %v298_v9 = vrot.slane %v2927_v6, 1 }
   0xc   :  { %131 = vst.msk [vmem:[#allocation2 + $0x40] sm:$0xff] %vm121_vm1, %v4550_v2  ;;  %v2939_v10 = vld [vmem:[#allocation2 + $0x8] sm:$0x3]  ;;  %v270_v11 = vrot.slane %v2933_v7, 1  ;;  %2539 = vmatmul.msk.f32.vlgmr.msra.gmra.mxu1 %vm121_vm1, %v2933_v7  ;;  %v522_v56 = vrot.slane %v2933_v7, 2 }
   0xd   :  { %132 = vst.msk [vmem:[#allocation2 + $0x48] sm:$0x3] %vm123_vm2, %v4550_v2  ;;  %v271_v12 = vrot.slane %v2939_v10, 1  ;;  %v2948_v13 = vsel %vm269_vm3, %v297_v8, %v298_v9  ;;  %v523_v57 = vrot.slane %v2939_v10, 2 }
   0xe   :  { %133 = vst.msk [vmem:[#allocation2 + $0x50] sm:$0xff] %vm121_vm1, %v4550_v2  ;;  %2531 = vmatmul.msk.f32.vlgmr.msra.gmra.mxu3 %vm121_vm1, %v2948_v13 }
   0xf   :  { %134 = vst.msk [vmem:[#allocation2 + $0x58] sm:$0x3] %vm123_vm2, %v4550_v2  ;;  %v272_v14 = vsel %vm269_vm3, %v270_v11, %v271_v12  ;;  %v524_v60 = vsel %vm521_vm4, %v522_v56, %v523_v57  ;;  %v2627_v11 = vld [vmem:[%s4543_s1 + $0x18] sm:$0xf] }
  0x10   :  { %135 = vst.msk [vmem:[#allocation2 + $0x60] sm:$0xff] %vm121_vm1, %v4550_v2  ;;  %2522 = vmatmul.msk.f32.vlgmr.msra.gmra.mxu0 %vm121_vm1, %v272_v14  ;;  %2628 = vmatpush.msk.msra.mxu2 %vm352_vm0, %v2627_v11 }
  0x11   :  { %136 = vst.msk [vmem:[#allocation2 + $0x68] sm:$0x3] %vm123_vm2, %v4550_v2 }
  0x12   :  { %137 = vst.msk [vmem:[#allocation2 + $0x70] sm:$0xff] %vm121_vm1, %v4550_v2 }
  0x13   :  { %138 = vst.msk [vmem:[#allocation2 + $0x78] sm:$0x3] %vm123_vm2, %v4550_v2 }
  0x14   :  { %139 = vst.msk [vmem:[#allocation2 + $0x80] sm:$0xff] %vm121_vm1, %v4550_v2 }
  0x15   :  { %140 = vst.msk [vmem:[#allocation2 + $0x88] sm:$0x3] %vm123_vm2, %v4550_v2 }
  0x16   :  { %141 = vst.msk [vmem:[#allocation2 + $0x90] sm:$0xff] %vm121_vm1, %v4550_v2 }
  0x17   :  { %142 = vst.msk [vmem:[#allocation2 + $0x98] sm:$0x3] %vm123_vm2, %v4550_v2 }
  0x18   :  { %143 = vst.msk [vmem:[#allocation2 + $0xa0] sm:$0xff] %vm121_vm1, %v4550_v2 }
  0x19   :  { %144 = vst.msk [vmem:[#allocation2 + $0xa8] sm:$0x3] %vm123_vm2, %v4550_v2 }
  0x1a   :  { %147 = vst.msk [vmem:[#allocation2 + $0xc0] sm:$0xff] %vm121_vm1, %v4550_v2 }
  0x1b   :  { %148 = vst.msk [vmem:[#allocation2 + $0xc8] sm:$0x3] %vm123_vm2, %v4550_v2 }
  0x1c   :  { %149 = vst.msk [vmem:[#allocation2 + $0xd0] sm:$0xff] %vm121_vm1, %v4550_v2 }
  0x1d   :  { %150 = vst.msk [vmem:[#allocation2 + $0xd8] sm:$0x3] %vm123_vm2, %v4550_v2 }
  0x1e   :  { %151 = vst.msk [vmem:[#allocation2 + $0xe0] sm:$0xff] %vm121_vm1, %v4550_v2 }
  0x1f   :  { %152 = vst.msk [vmem:[#allocation2 + $0xe8] sm:$0x3] %vm123_vm2, %v4550_v2 }
  0x20   :  { %153 = vst.msk [vmem:[#allocation2 + $0xf0] sm:$0xff] %vm121_vm1, %v4550_v2 }
  0x21   :  { %154 = vst.msk [vmem:[#allocation2 + $0xf8] sm:$0x3] %vm123_vm2, %v4550_v2 }
  0x22   :  { %155 = vst.msk [vmem:[#allocation2 + $0x100] sm:$0xff] %vm121_vm1, %v4550_v2 }
  0x23   :  { %156 = vst.msk [vmem:[#allocation2 + $0x108] sm:$0x3] %vm123_vm2, %v4550_v2 }
  0x24   :  { %157 = vst.msk [vmem:[#allocation2 + $0x110] sm:$0xff] %vm121_vm1, %v4550_v2 }
  0x25   :  { %158 = vst.msk [vmem:[#allocation2 + $0x118] sm:$0x3] %vm123_vm2, %v4550_v2 }
  0x26   :  { %159 = vst.msk [vmem:[#allocation2 + $0x120] sm:$0xff] %vm121_vm1, %v4550_v2 }
  0x27   :  { %160 = vst.msk [vmem:[#allocation2 + $0x128] sm:$0x3] %vm123_vm2, %v4550_v2 }
  0x28   :  { %161 = vst.msk [vmem:[#allocation2 + $0x130] sm:$0xff] %vm121_vm1, %v4550_v2 }
  0x29   :  { %162 = vst.msk [vmem:[#allocation2 + $0x138] sm:$0x3] %vm123_vm2, %v4550_v2 }
  0x2a   :  { %189 = vst.msk [vmem:[#allocation2 + $0xc1] sm:$0xff] %vm121_vm1, %v90_v17 }
  0x2b   :  { %180 = vst.msk [vmem:[#allocation2 + $0x11] sm:$0xff] %vm121_vm1, %v72_v18 }
  0x2c   :  { %190 = vst.msk [vmem:[#allocation2 + $0xd1] sm:$0xff] %vm121_vm1, %v92_v19 }
  0x2d   :  { %181 = vst.msk [vmem:[#allocation2 + $0x21] sm:$0xff] %vm121_vm1, %v74_v20  ;;  %v2645_v20 = vld [vmem:[%s4543_s1 + $0x1c] sm:$0xf] }
  0x2e   :  { %191 = vst.msk [vmem:[#allocation2 + $0xe1] sm:$0xff] %vm121_vm1, %v94_v21  ;;  %2646 = vmatpush.msk.msra.mxu3 %vm352_vm0, %v2645_v20 }
  0x2f   :  { %182 = vst.msk [vmem:[#allocation2 + $0x31] sm:$0xff] %vm121_vm1, %v76_v22 }
  0x30   :  { %192 = vst.msk [vmem:[#allocation2 + $0xf1] sm:$0xff] %vm121_vm1, %v96_v23 }
  0x31   :  { %v3055_v27 = vld [vmem:[#allocation2 + $0xc0] sm:$0xff]  ;;  %v3057_v28 = vld [vmem:[#allocation2 + $0xc8] sm:$0x3]  ;;  %183 = vst.msk [vmem:[#allocation2 + $0x41] sm:$0xff] %vm121_vm1, %v78_v24 }
  0x32   :  { %2549 = vmatmul.msk.f32.gmra.mxu2 %vm121_vm1, %v3055_v27  ;;  %v3062_v29 = vld [vmem:[#allocation2 + $0x10] sm:$0xff]  ;;  %v3064_v30 = vld [vmem:[#allocation2 + $0x18] sm:$0x3]  ;;  %v300_v31 = vrot.slane %v3055_v27, 1  ;;  %v301_v32 = vrot.slane %v3057_v28, 1  ;;  %193 = vst.msk [vmem:[#allocation2 + $0x101] sm:$0xff] %vm121_vm1, %v98_v25 }
  0x33   :  { %v273_v33 = vrot.slane %v3062_v29, 1  ;;  %v274_v34 = vrot.slane %v3064_v30, 1  ;;  %2540 = vmatmul.msk.f32.gmra.mxu1 %vm121_vm1, %v3062_v29  ;;  %v3073_v35 = vld [vmem:[#allocation2 + $0xd0] sm:$0xff]  ;;  %v3075_v36 = vld [vmem:[#allocation2 + $0xd8] sm:$0x3]  ;;  %184 = vst.msk [vmem:[#allocation2 + $0x51] sm:$0xff] %vm121_vm1, %v80_v26 }
  0x34   :  { %v3079_v37 = vsel %vm269_vm3, %v300_v31, %v301_v32  ;;  %v3081_v38 = vld [vmem:[#allocation2 + $0x20] sm:$0xff]  ;;  %v3083_v39 = vld [vmem:[#allocation2 + $0x28] sm:$0x3]  ;;  %194 = vst.msk [vmem:[#allocation2 + $0x111] sm:$0xff] %vm121_vm1, %v100_v40  ;;  %v303_v42 = vrot.slane %v3073_v35, 1  ;;  %v304_v43 = vrot.slane %v3075_v36, 1 }
  0x35   :  { %v3089_v41 = vsel %vm269_vm3, %v273_v33, %v274_v34  ;;  %2532 = vmatmul.msk.f32.gmra.mxu3 %vm121_vm1, %v3079_v37  ;;  %v276_v45 = vrot.slane %v3081_v38, 1  ;;  %v277_v46 = vrot.slane %v3083_v39, 1  ;;  %185 = vst.msk [vmem:[#allocation2 + $0x61] sm:$0xff] %vm121_vm1, %v82_v44  ;;  %v3109_v48 = vld [vmem:[#allocation2 + $0xe0] sm:$0xff]  ;;  %v3119_v51 = vld [vmem:[#allocation2 + $0xe8] sm:$0x3] }
  0x36   :  { %2523 = vmatmul.msk.f32.gmra.mxu0 %vm121_vm1, %v3089_v41  ;;  %v3107_v47 = vsel %vm269_vm3, %v303_v42, %v304_v43  ;;  %186 = vst.msk [vmem:[#allocation2 + $0x71] sm:$0xff] %vm121_vm1, %v84_v49  ;;  %v3122_v52 = vld [vmem:[#allocation2 + $0x30] sm:$0xff]  ;;  %v3124_v53 = vld [vmem:[#allocation2 + $0x38] sm:$0x3]  ;;  %v306_v54 = vrot.slane %v3109_v48, 1  ;;  %v307_v55 = vrot.slane %v3119_v51, 1 }
  0x37   :  { %v3115_v50 = vsel %vm269_vm3, %v276_v45, %v277_v46  ;;  %v279_v58 = vrot.slane %v3122_v52, 1  ;;  %v280_v59 = vrot.slane %v3124_v53, 1  ;;  %v3147_v63 = vld [vmem:[#allocation2 + $0xf0] sm:$0xff]  ;;  %v3149_v0 = vld [vmem:[#allocation2 + $0xf8] sm:$0x3]  ;;  %v532_v20 = vrot.slane %v3124_v53, 2 }
  0x38   :  { %v3140_v61 = vsel %vm269_vm3, %v306_v54, %v307_v55  ;;  %v3151_v1 = vld [vmem:[#allocation2 + $0x40] sm:$0xff]  ;;  %v3153_v3 = vld [vmem:[#allocation2 + $0x48] sm:$0x3]  ;;  %v309_v4 = vrot.slane %v3147_v63, 1  ;;  %v310_v7 = vrot.slane %v3149_v0, 1 }
  0x39   :  { %v3143_v62 = vsel %vm269_vm3, %v279_v58, %v280_v59  ;;  %v282_v8 = vrot.slane %v3151_v1, 1  ;;  %v283_v9 = vrot.slane %v3153_v3, 1  ;;  %v3176_v14 = vld [vmem:[#allocation2 + $0x100] sm:$0xff]  ;;  %v3178_v15 = vld [vmem:[#allocation2 + $0x108] sm:$0x3]  ;;  %v525_v58 = vrot.slane %v3062_v29, 2 }
  0x3a   :  { %2550 = vmatmul.msk.f32.gmra.mxu2 %vm121_vm1, %v3073_v35  ;;  %v3166_v10 = vsel %vm269_vm3, %v309_v4, %v310_v7  ;;  %v3181_v16 = vld [vmem:[#allocation2 + $0x50] sm:$0xff]  ;;  %v3183_v17 = vld [vmem:[#allocation2 + $0x58] sm:$0x3]  ;;  %v312_v18 = vrot.slane %v3176_v14, 1  ;;  %v313_v19 = vrot.slane %v3178_v15, 1  ;;  %v526_v59 = vrot.slane %v3064_v30, 2 }
  0x3b   :  { %2541 = vmatmul.msk.f32.gmra.mxu1 %vm121_vm1, %v3081_v38  ;;  %v3172_v12 = vsel %vm269_vm3, %v282_v8, %v283_v9  ;;  %v285_v21 = vrot.slane %v3181_v16, 1  ;;  %v286_v22 = vrot.slane %v3183_v17, 1  ;;  %v3207_v25 = vld [vmem:[#allocation2 + $0x110] sm:$0xff]  ;;  %v3209_v26 = vld [vmem:[#allocation2 + $0x118] sm:$0x3]  ;;  %v216_v4 = vld [vmem:[#allocation2 + $0xa0] sm:$0xff] }
  0x3c   :  { %v3200_v23 = vsel %vm269_vm3, %v312_v18, %v313_v19  ;;  %v3211_v31 = vld [vmem:[#allocation2 + $0x60] sm:$0xff]  ;;  %v3213_v32 = vld [vmem:[#allocation2 + $0x68] sm:$0x3]  ;;  %v315_v33 = vrot.slane %v3207_v25, 1  ;;  %v316_v34 = vrot.slane %v3209_v26, 1  ;;  %v294_v8 = vrot.slane %v216_v4, 1 }
  0x3d   :  { %2533 = vmatmul.msk.f32.gmra.mxu3 %vm121_vm1, %v3107_v47  ;;  %v3203_v24 = vsel %vm269_vm3, %v285_v21, %v286_v22  ;;  %v2663_v40 = vld [vmem:[%s4543_s1 + $0x20] sm:$0xf]  ;;  %v2609_v42 = vld [vmem:[%s4543_s1 + $0x14] sm:$0xf]  ;;  %v288_v43 = vrot.slane %v3211_v31, 1  ;;  %v289_v44 = vrot.slane %v3213_v32, 1 }
  0x3e   :  { %2524 = vmatmul.msk.f32.gmra.mxu0 %vm121_vm1, %v3115_v50  ;;  %2610 = vmatpush.msk.msrb.mxu1 %vm352_vm0, %v2609_v42  ;;  %v3234_v45 = vsel %vm269_vm3, %v315_v33, %v316_v34  ;;  %v3241_v49 = vld [vmem:[#allocation2 + $0x70] sm:$0xff]  ;;  %v3243_v54 = vld [vmem:[#allocation2 + $0x78] sm:$0x3]  ;;  %v217_v7 = vld [vmem:[#allocation2 + $0xa8] sm:$0x3]  ;;  %v528_v30 = vrot.slane %v3081_v38, 2 }
  0x3f   :  { %2664 = vmatpush.msk.msra.mxu0 %vm352_vm0, %v2663_v40  ;;  %v3237_v46 = vsel %vm269_vm3, %v288_v43, %v289_v44  ;;  %v291_v55 = vrot.slane %v3241_v49, 1  ;;  %v292_v56 = vrot.slane %v3243_v54, 1  ;;  %v295_v9 = vrot.slane %v217_v7, 1 }
  0x40   :  { %v529_v18 = vrot.slane %v3083_v39, 2  ;;  %v531_v19 = vrot.slane %v3122_v52, 2  ;;  %v86_v39 = vld [vmem:[%s4542_s0 + $0x70] sm:$0xff]  ;;  %v534_v53 = vrot.slane %v3151_v1, 2  ;;  %v535_v22 = vrot.slane %v3153_v3, 2 }
  0x41   :  { %v3253_v57 = vsel %vm269_vm3, %v291_v55, %v292_v56  ;;  %v296_v11 = vsel %vm269_vm3, %v294_v8, %v295_v9  ;;  %187 = vst.msk [vmem:[#allocation2 + $0x81] sm:$0xff] %vm121_vm1, %v86_v39  ;;  %v537_v33 = vrot.slane %v3181_v16, 2  ;;  %v538_v34 = vrot.slane %v3183_v17, 2 }
  0x42   :  { %2551 = vmatmul.msk.f32.gmra.mxu2 %vm121_vm1, %v3109_v48  ;;  %v3288_v21 = vsel %vm521_vm4, %v531_v19, %v532_v20  ;;  %v540_v40 = vrot.slane %v3211_v31, 2  ;;  %v541_v42 = vrot.slane %v3213_v32, 2  ;;  %v543_v43 = vrot.slane %v3241_v49, 2 }
  0x43   :  { %2542 = vmatmul.msk.f32.gmra.mxu1 %vm121_vm1, %v3122_v52  ;;  %v3315_v3 = vsel %vm521_vm4, %v537_v33, %v538_v34  ;;  %v544_v44 = vrot.slane %v3243_v54, 2  ;;  %v546_v56 = vrot.slane %v216_v4, 2  ;;  %v553_v39 = vrot.slane %v3057_v28, 2 }
  0x44   :  { %v3328_v17 = vsel %vm521_vm4, %v540_v40, %v541_v42  ;;  %v555_v28 = vrot.slane %v3073_v35, 2  ;;  %v556_v34 = vrot.slane %v3075_v36, 2  ;;  %v102_v42 = vld [vmem:[%s4542_s0 + $0x170] sm:$0xff] }
  0x45   :  { %2534 = vmatmul.msk.f32.gmra.mxu3 %vm121_vm1, %v3140_v61  ;;  %v3341_v32 = vsel %vm521_vm4, %v543_v43, %v544_v44  ;;  %195 = vst.msk [vmem:[#allocation2 + $0x121] sm:$0xff] %vm121_vm1, %v102_v42 }
  0x46   :  { %2525 = vmatmul.msk.f32.gmra.mxu0 %vm121_vm1, %v3143_v62  ;;  %v3405_v43 = vsel %vm521_vm4, %v555_v28, %v556_v34  ;;  %v565_v28 = vrot.slane %v3178_v15, 2  ;;  %v567_v15 = vrot.slane %v3207_v25, 2 }
  0x48   :  { %v3345_v55 = vld [vmem:[#allocation2 + $0x80] sm:$0xff]  ;;  %v213_v8 = vld [vmem:[#allocation2 + $0x88] sm:$0x3] }
  0x4a   :  { %2552 = vmatmul.msk.f32.gmra.mxu2 %vm121_vm1, %v3147_v63 }
  0x4b   :  { %2543 = vmatmul.msk.f32.gmra.mxu1 %vm121_vm1, %v3151_v1 }
  0x4d   :  { %2535 = vmatmul.msk.f32.gmra.mxu3 %vm121_vm1, %v3166_v10 }
  0x4e   :  { %2526 = vmatmul.msk.f32.gmra.mxu0 %vm121_vm1, %v3172_v12 }
  0x52   :  { %2553 = vmatmul.msk.f32.gmra.mxu2 %vm121_vm1, %v3176_v14 }
  0x53   :  { %2544 = vmatmul.msk.f32.gmra.mxu1 %vm121_vm1, %v3181_v16 }
  0x55   :  { %2536 = vmatmul.msk.f32.gmra.mxu3 %vm121_vm1, %v3200_v23 }
  0x56   :  { %2527 = vmatmul.msk.f32.gmra.mxu0 %vm121_vm1, %v3203_v24 }
  0x5a   :  { %2554 = vmatmul.msk.f32.gmra.mxu2 %vm121_vm1, %v3207_v25 }
  0x5b   :  { %2545 = vmatmul.msk.f32.gmra.mxu1 %vm121_vm1, %v3211_v31 }
  0x5d   :  { %2537 = vmatmul.msk.f32.gmra.mxu3 %vm121_vm1, %v3234_v45 }
  0x5e   :  { %2528 = vmatmul.msk.f32.gmra.mxu0 %vm121_vm1, %v3237_v46 }
  0x62   :  { %2557 = vmatmul.msk.f32.vlgmr.msrb.gmra.mxu2 %vm121_vm1, %v524_v60  ;;  %v527_v60 = vsel %vm521_vm4, %v525_v58, %v526_v59  ;;  %v547_v58 = vrot.slane %v217_v7, 2  ;;  %v549_v59 = vrot.slane %v2922_v5, 2  ;;  %v879_v7 = vrot.slane %v213_v8, 2 }
  0x63   :  { %2546 = vmatmul.msk.f32.gmra.mxu1 %vm121_vm1, %v3241_v49 }
  0x64   :  { %v548_v54 = vsel %vm521_vm4, %v546_v56, %v547_v58  ;;  %v559_v58 = vrot.slane %v3119_v51, 2  ;;  %v561_v51 = vrot.slane %v3147_v63, 2 }
  0x65   :  { %2575 = vmatmul.msk.f32.vlgmr.msrb.gmra.mxu3 %vm121_vm1, %v3062_v29  ;;  %v3273_v29 = vsel %vm521_vm4, %v528_v30, %v529_v18  ;;  %v783_v30 = vrot.slane %v213_v8, 1 }
  0x66   :  { %2529 = vmatmul.msk.f32.gmra.mxu0 %vm121_vm1, %v3253_v57 }
  0x6a   :  { %2558 = vmatmul.msk.f32.gmra.mxu2 %vm121_vm1, %v527_v60 }
  0x6b   :  { %2547 = vmatmul.msk.f32.gmra.mxu1 %vm121_vm1, %v216_v4  ;;  %v878_v4 = vrot.slane %v3345_v55, 2 }
  0x6d   :  { %2576 = vmatmul.msk.f32.gmra.mxu3 %vm121_vm1, %v3081_v38  ;;  %v3367_v18 = vsel %vm521_vm4, %v878_v4, %v879_v7  ;;  %v562_v7 = vrot.slane %v3149_v0, 2  ;;  %v564_v0 = vrot.slane %v3176_v14, 2 }
  0x6e   :  { %2530 = vmatmul.msk.f32.gmra.mxu0 %vm121_vm1, %v296_v11  ;;  %v782_v11 = vrot.slane %v3345_v55, 1 }
  0x72   :  { %2559 = vmatmul.msk.f32.gmra.mxu2 %vm121_vm1, %v3273_v29 }
  0x73   :  { %2611 = vmatmul.msk.f32.vlgmr.msrb.gmra.mxu1 %vm121_vm1, %v527_v60  ;;  %v550_v60 = vrot.slane %v2927_v6, 2  ;;  %v3373_v6 = vsel %vm269_vm3, %v782_v11, %v783_v30  ;;  %v3440_v11 = vsel %vm521_vm4, %v561_v51, %v562_v7 }
  0x75   :  { %2577 = vmatmul.msk.f32.gmra.mxu3 %vm121_vm1, %v3122_v52  ;;  %v551_v9 = vsel %vm521_vm4, %v549_v59, %v550_v60 }
  0x76   :  { %2593 = vmatmul.msk.f32.vlgmr.msrb.gmra.mxu0 %vm121_vm1, %v3089_v41  ;;  %v3302_v41 = vsel %vm521_vm4, %v534_v53, %v535_v22 }
  0x7a   :  { %2560 = vmatmul.msk.f32.gmra.mxu2 %vm121_vm1, %v3288_v21 }
  0x7b   :  { %2612 = vmatmul.msk.f32.gmra.mxu1 %vm121_vm1, %v3273_v29 }
  0x7d   :  { %2578 = vmatmul.msk.f32.gmra.mxu3 %vm121_vm1, %v3151_v1 }
  0x7e   :  { %2594 = vmatmul.msk.f32.gmra.mxu0 %vm121_vm1, %v3115_v50 }
  0x82   :  { %2561 = vmatmul.msk.f32.gmra.mxu2 %vm121_vm1, %v3302_v41 }
  0x83   :  { %2613 = vmatmul.msk.f32.gmra.mxu1 %vm121_vm1, %v3288_v21 }
  0x85   :  { %2579 = vmatmul.msk.f32.gmra.mxu3 %vm121_vm1, %v3181_v16 }
  0x86   :  { %2595 = vmatmul.msk.f32.gmra.mxu0 %vm121_vm1, %v3143_v62 }
  0x8a   :  { %2562 = vmatmul.msk.f32.gmra.mxu2 %vm121_vm1, %v3315_v3 }
  0x8b   :  { %2614 = vmatmul.msk.f32.gmra.mxu1 %vm121_vm1, %v3302_v41 }
  0x8d   :  { %2580 = vmatmul.msk.f32.gmra.mxu3 %vm121_vm1, %v3211_v31  ;;  %v3369_v19 = vpop.f32.mrf.mxu0 }
  0x8e   :  { %2596 = vmatmul.msk.f32.gmra.mxu0 %vm121_vm1, %v3172_v12  ;;  %v3375_v20 = vpop.f32.mrf.mxu2 }
  0x91   :  { %v3385_v53 = vpop.f32.mrf.mxu3 }
  0x92   :  { %2563 = vmatmul.msk.f32.gmra.mxu2 %vm121_vm1, %v3328_v17 }
  0x93   :  { %2615 = vmatmul.msk.f32.gmra.mxu1 %vm121_vm1, %v3315_v3 }
  0x95   :  { %2581 = vmatmul.msk.f32.gmra.mxu3 %vm121_vm1, %v3241_v49 }
  0x96   :  { %2597 = vmatmul.msk.f32.gmra.mxu0 %vm121_vm1, %v3203_v24 }
  0x9a   :  { %2564 = vmatmul.msk.f32.gmra.mxu2 %vm121_vm1, %v3341_v32 }
  0x9b   :  { %2616 = vmatmul.msk.f32.gmra.mxu1 %vm121_vm1, %v3328_v17 }
  0x9d   :  { %2582 = vmatmul.msk.f32.gmra.mxu3 %vm121_vm1, %v3345_v55 }
  0x9e   :  { %2598 = vmatmul.msk.f32.gmra.mxu0 %vm121_vm1, %v3237_v46 }
  0xa2   :  { %2565 = vmatmul.msk.f32.gmra.mxu2 %vm121_vm1, %v548_v54 }
  0xa3   :  { %2617 = vmatmul.msk.f32.gmra.mxu1 %vm121_vm1, %v3341_v32 }
  0xa5   :  { %2583 = vmatmul.msk.f32.gmra.mxu3 %vm121_vm1, %v2922_v5  ;;  %v552_v5 = vrot.slane %v3055_v27, 2 }
  0xa6   :  { %2599 = vmatmul.msk.f32.gmra.mxu0 %vm121_vm1, %v3253_v57 }
  0xa7   :  { %v3388_v22 = vsel %vm521_vm4, %v552_v5, %v553_v39 }
  0xaa   :  { %2566 = vmatmul.msk.f32.gmra.mxu2 %vm121_vm1, %v551_v9 }
  0xab   :  { %2618 = vmatmul.msk.f32.gmra.mxu1 %vm121_vm1, %v3367_v18 }
  0xad   :  { %2584 = vmatmul.msk.f32.gmra.mxu3 %vm121_vm1, %v3055_v27 }
  0xae   :  { %2600 = vmatmul.msk.f32.gmra.mxu0 %vm121_vm1, %v3373_v6 }
  0xb2   :  { %2567 = vmatmul.msk.f32.gmra.mxu2 %vm121_vm1, %v3388_v22 }
  0xb3   :  { %v3392_v33 = vpop.f32.mrf.mxu0  ;;  %2619 = vmatmul.msk.f32.gmra.mxu1 %vm121_vm1, %v551_v9 }
  0xb5   :  { %v503_v40 = vpop.f32.mrf.mxu2  ;;  %2585 = vmatmul.msk.f32.gmra.mxu3 %vm121_vm1, %v3073_v35 }
  0xb6   :  { %2601 = vmatmul.msk.f32.gmra.mxu0 %vm121_vm1, %v2948_v13  ;;  %v558_v13 = vrot.slane %v3109_v48, 2 }
  0xb8   :  { %v403_v44 = vpop.f32.mrf.mxu3  ;;  %v3423_v59 = vsel %vm521_vm4, %v558_v13, %v559_v58 }
  0xb9   :  { %v3408_v56 = vadd.f32 %v503_v40, %v403_v44  ;;  %v3457_v40 = vsel %vm521_vm4, %v564_v0, %v565_v28  ;;  %v473_v44 = vpop.f32.mrf.mxu1 }
  0xba   :  { %2568 = vmatmul.msk.f32.gmra.mxu2 %vm121_vm1, %v3405_v43 }
  0xbb   :  { %v3412_v36 = vpop.f32.mrf.mxu0  ;;  %2620 = vmatmul.msk.f32.gmra.mxu1 %vm121_vm1, %v3388_v22 }
  0xbd   :  { %v506_v54 = vpop.f32.mrf.mxu2  ;;  %2586 = vmatmul.msk.f32.gmra.mxu3 %vm121_vm1, %v3109_v48 }
  0xbe   :  { %2602 = vmatmul.msk.f32.gmra.mxu0 %vm121_vm1, %v3079_v37 }
  0xc0   :  { %v406_v60 = vpop.f32.mrf.mxu3 }
  0xc1   :  { %v3425_v8 = vadd.f32 %v506_v54, %v406_v60  ;;  %v568_v54 = vrot.slane %v3209_v26, 2  ;;  %v476_v0 = vpop.f32.mrf.mxu1 }
  0xc2   :  { %2569 = vmatmul.msk.f32.gmra.mxu2 %vm121_vm1, %v3423_v59 }
  0xc3   :  { %v3429_v4 = vpop.f32.mrf.mxu0  ;;  %2621 = vmatmul.msk.f32.gmra.mxu1 %vm121_vm1, %v3405_v43  ;;  %v3474_v51 = vsel %vm521_vm4, %v567_v15, %v568_v54 }
  0xc5   :  { %v509_v9 = vpop.f32.mrf.mxu2  ;;  %2587 = vmatmul.msk.f32.gmra.mxu3 %vm121_vm1, %v3147_v63 }
  0xc6   :  { %2603 = vmatmul.msk.f32.gmra.mxu0 %vm121_vm1, %v3107_v47 }
  0xc8   :  { %v409_v30 = vpop.f32.mrf.mxu3 }
  0xc9   :  { %v3442_v5 = vadd.f32 %v509_v9, %v409_v30  ;;  %v3480_v30 = vld [vmem:[#allocation2 + $0x120] sm:$0xff] }
  0xca   :  { %2570 = vmatmul.msk.f32.gmra.mxu2 %vm121_vm1, %v3440_v11  ;;  %v881_v2 = vrot.slane %v3480_v30, 2 }
  0xcb   :  { %4552 = vst [vmem:[#allocation5_spill] sm:$0xff] %v3442_v5  ;;  %v3446_v39 = vpop.f32.mrf.mxu0  ;;  %2622 = vmatmul.msk.f32.gmra.mxu1 %vm121_vm1, %v3423_v59 }
  0xcd   :  { %v512_v34 = vpop.f32.mrf.mxu2  ;;  %2588 = vmatmul.msk.f32.gmra.mxu3 %vm121_vm1, %v3176_v14 }
  0xce   :  { %2604 = vmatmul.msk.f32.gmra.mxu0 %vm121_vm1, %v3140_v61 }
  0xd0   :  { %v412_v42 = vpop.f32.mrf.mxu3 }
  0xd1   :  { %v3459_v13 = vadd.f32 %v512_v34, %v412_v42  ;;  %v2682_v34 = vld [vmem:[%s4545_s3 + $0x18] sm:$0xff] }
  0xd2   :  { %2571 = vmatmul.msk.f32.gmra.mxu2 %vm121_vm1, %v3457_v40  ;;  %1526 = vmatpush.msra.mxu1 %v2682_v34 }
  0xd3   :  { %4553 = vst [vmem:[#allocation6_spill] sm:$0xff] %v3459_v13  ;;  %v3463_v58 = vpop.f32.mrf.mxu0  ;;  %2623 = vmatmul.msk.f32.gmra.mxu1 %vm121_vm1, %v3440_v11  ;;  %v479_v13 = vpop.f32.mrf.mxu1 }
  0xd5   :  { %v515_v60 = vpop.f32.mrf.mxu2  ;;  %2589 = vmatmul.msk.f32.gmra.mxu3 %vm121_vm1, %v3207_v25 }
  0xd6   :  { %2605 = vmatmul.msk.f32.gmra.mxu0 %vm121_vm1, %v3166_v10 }
  0xd8   :  { %v415_v7 = vpop.f32.mrf.mxu3 }
  0xd9   :  { %v3476_v9 = vadd.f32 %v515_v60, %v415_v7  ;;  %v233_v60 = vld [vmem:[#allocation2 + $0x128] sm:$0x3]  ;;  %v474_v7 = vadd.f32 %v473_v44, %v3369_v19 }
  0xda   :  { %2572 = vmatmul.msk.f32.gmra.mxu2 %vm121_vm1, %v3474_v51  ;;  %v786_v34 = vrot.slane %v233_v60, 1 }
  0xdb   :  { %4554 = vst [vmem:[#allocation7_spill] sm:$0xff] %v3476_v9  ;;  %v3482_v26 = vpop.f32.mrf.mxu0  ;;  %2624 = vmatmul.msk.f32.gmra.mxu1 %vm121_vm1, %v3457_v40  ;;  %v882_v9 = vrot.slane %v233_v60, 2 }
  0xdd   :  { %v518_v28 = vpop.f32.mrf.mxu2  ;;  %2590 = vmatmul.msk.f32.gmra.mxu3 %vm121_vm1, %v3480_v30 }
  0xde   :  { %2606 = vmatmul.msk.f32.gmra.mxu0 %vm121_vm1, %v3200_v23 }
  0xe0   :  { %v418_v42 = vpop.f32.mrf.mxu3 }
  0xe1   :  { %v3493_v15 = vadd.f32 %v518_v28, %v418_v42  ;;  %v785_v28 = vrot.slane %v3480_v30, 1 }
  0xe2   :  { %2629 = vmatmul.msk.f32.vlgmr.msra.gmra.mxu2 %vm121_vm1, %v3081_v38 }
  0xe3   :  { %4555 = vst [vmem:[#allocation8_spill] sm:$0xff] %v3493_v15  ;;  %v3497_v54 = vpop.f32.mrf.mxu0  ;;  %2625 = vmatmul.msk.f32.gmra.mxu1 %vm121_vm1, %v3474_v51  ;;  %v3509_v15 = vsel %vm521_vm4, %v881_v2, %v882_v9  ;;  %v482_v9 = vpop.f32.mrf.mxu1 }
  0xe5   :  { %v624_v5 = vpop.f32.mrf.mxu2  ;;  %2647 = vmatmul.msk.f32.vlgmr.msra.gmra.mxu3 %vm121_vm1, %v3115_v50  ;;  %v3518_v50 = vsel %vm269_vm3, %v785_v28, %v786_v34  ;;  %v480_v28 = vadd.f32 %v479_v13, %v3412_v36 }
  0xe6   :  { %2607 = vmatmul.msk.f32.gmra.mxu0 %vm121_vm1, %v3234_v45  ;;  %v672_v38 = vadd.f32 %v624_v5, %v474_v7  ;;  %v477_v5 = vadd.f32 %v476_v0, %v3392_v33 }
  0xe8   :  { %v716_v42 = vpop.f32.mrf.mxu3 }
  0xe9   :  { %v3511_v19 = vadd.f32 %v716_v42, %v672_v38 }
  0xea   :  { %2630 = vmatmul.msk.f32.gmra.mxu2 %vm121_vm1, %v3122_v52 }
  0xeb   :  { %v3515_v44 = vpop.f32.mrf.mxu0  ;;  %2626 = vmatmul.msk.f32.gmra.mxu1 %vm121_vm1, %v3509_v15  ;;  %v485_v34 = vpop.f32.mrf.mxu1 }
  0xed   :  { %v627_v60 = vpop.f32.mrf.mxu2  ;;  %2648 = vmatmul.msk.f32.gmra.mxu3 %vm121_vm1, %v3143_v62 }
  0xee   :  { %2608 = vmatmul.msk.f32.gmra.mxu0 %vm121_vm1, %v3518_v50  ;;  %v673_v2 = vadd.f32 %v627_v60, %v477_v5  ;;  %v483_v5 = vadd.f32 %v482_v9, %v3429_v4 }
  0xf0   :  { %v719_v52 = vpop.f32.mrf.mxu3 }
  0xf1   :  { %v3527_v7 = vadd.f32 %v719_v52, %v673_v2  ;;  %v486_v2 = vadd.f32 %v485_v34, %v3446_v39 }
  0xf2   :  { %2631 = vmatmul.msk.f32.gmra.mxu2 %vm121_vm1, %v3151_v1 }
  0xf3   :  { %v3531_v38 = vpop.f32.mrf.mxu0  ;;  %v488_v60 = vpop.f32.mrf.mxu1 }
  0xf4   :  { %v489_v52 = vadd.f32 %v488_v60, %v3463_v58 }
  0xf5   :  { %v630_v33 = vpop.f32.mrf.mxu2  ;;  %2649 = vmatmul.msk.f32.gmra.mxu3 %vm121_vm1, %v3172_v12 }
  0xf6   :  { %2665 = vmatmul.msk.f32.vlgmr.msra.gmra.mxu0 %vm121_vm1, %v3273_v29  ;;  %v674_v62 = vadd.f32 %v630_v33, %v480_v28 }
  0xf8   :  { %v722_v0 = vpop.f32.mrf.mxu3 }
  0xf9   :  { %v3538_v42 = vadd.f32 %v722_v0, %v674_v62  ;;  %v214_v62 = vld [vmem:[#allocation2 + $0x90] sm:$0xff]  ;;  %v215_v0 = vld [vmem:[#allocation2 + $0x98] sm:$0x3] }
  0xfa   :  { %2632 = vmatmul.msk.f32.gmra.mxu2 %vm121_vm1, %v3181_v16 }
  0xfb   :  { %v3542_v1 = vpop.f32.mrf.mxu0  ;;  %v491_v28 = vpop.f32.mrf.mxu1 }
  0xfc   :  { %v492_v58 = vadd.f32 %v491_v28, %v3482_v26 }
  0xfd   :  { %v633_v36 = vpop.f32.mrf.mxu2  ;;  %2650 = vmatmul.msk.f32.gmra.mxu3 %vm121_vm1, %v3203_v24 }
  0xfe   :  { %2666 = vmatmul.msk.f32.gmra.mxu0 %vm121_vm1, %v3288_v21  ;;  %v675_v12 = vadd.f32 %v633_v36, %v483_v5  ;;  %v1069_v5 = vrot.slane %v215_v0, 1 }
 0x100   :  { %v725_v29 = vpop.f32.mrf.mxu3 }
 0x101   :  { %v3549_v13 = vadd.f32 %v725_v29, %v675_v12 }
 0x102   :  { %2633 = vmatmul.msk.f32.gmra.mxu2 %vm121_vm1, %v3211_v31 }
 0x103   :  { %v3553_v16 = vpop.f32.mrf.mxu0  ;;  %v494_v36 = vpop.f32.mrf.mxu1 }
 0x104   :  { %v495_v26 = vadd.f32 %v494_v36, %v3497_v54  ;;  %v1395_v36 = vld [vmem:[%s4545_s3] sm:$0xff] }
 0x105   :  { %v636_v4 = vpop.f32.mrf.mxu2  ;;  %2651 = vmatmul.msk.f32.gmra.mxu3 %vm121_vm1, %v3237_v46 }
 0x106   :  { %2667 = vmatmul.msk.f32.gmra.mxu0 %vm121_vm1, %v3302_v41  ;;  %v676_v24 = vadd.f32 %v636_v4, %v486_v2 }
 0x108   :  { %v728_v21 = vpop.f32.mrf.mxu3 }
 0x109   :  { %v3560_v9 = vadd.f32 %v728_v21, %v676_v24 }
 0x10a   :  { %2634 = vmatmul.msk.f32.gmra.mxu2 %vm121_vm1, %v3241_v49 }
 0x10b   :  { %v3564_v31 = vpop.f32.mrf.mxu0  ;;  %v497_v24 = vpop.f32.mrf.mxu1 }
 0x10d   :  { %v639_v39 = vpop.f32.mrf.mxu2  ;;  %2652 = vmatmul.msk.f32.gmra.mxu3 %vm121_vm1, %v3253_v57 }
 0x10e   :  { %2668 = vmatmul.msk.f32.gmra.mxu0 %vm121_vm1, %v3315_v3  ;;  %v677_v46 = vadd.f32 %v639_v39, %v489_v52  ;;  %v1068_v3 = vrot.slane %v214_v62, 1  ;;  %v498_v52 = vadd.f32 %v497_v24, %v3515_v44  ;;  %v1164_v39 = vrot.slane %v214_v62, 2 }
 0x110   :  { %v731_v41 = vpop.f32.mrf.mxu3 }
 0x111   :  { %v3571_v33 = vadd.f32 %v731_v41, %v677_v46  ;;  %v1165_v46 = vrot.slane %v215_v0, 2 }
 0x112   :  { %2635 = vmatmul.msk.f32.gmra.mxu2 %vm121_vm1, %v3345_v55  ;;  %v1070_v55 = vsel %vm269_vm3, %v1068_v3, %v1069_v5 }
 0x113   :  { %v3575_v49 = vpop.f32.mrf.mxu0  ;;  %v1166_v44 = vsel %vm521_vm4, %v1164_v39, %v1165_v46 }
 0x115   :  { %v642_v34 = vpop.f32.mrf.mxu2  ;;  %2653 = vmatmul.msk.f32.gmra.mxu3 %vm121_vm1, %v3373_v6  ;;  %v2681_v6 = vld [vmem:[%s4545_s3 + $0x10] sm:$0xff] }
 0x116   :  { %2669 = vmatmul.msk.f32.gmra.mxu0 %vm121_vm1, %v3328_v17  ;;  %v678_v57 = vadd.f32 %v642_v34, %v492_v58  ;;  %1527 = vmatpush.msra.mxu1 %v2681_v6 }
 0x118   :  { %v734_v12 = vpop.f32.mrf.mxu3 }
 0x119   :  { %v3582_v29 = vadd.f32 %v734_v12, %v678_v57  ;;  %v3689_v57 = vld [vmem:[#allocation2 + $0x138] sm:$0x3] }
 0x11a   :  { %2636 = vmatmul.msk.f32.gmra.mxu2 %vm121_vm1, %v214_v62 }
 0x11b   :  { %v3586_v60 = vpop.f32.mrf.mxu0 }
 0x11d   :  { %v645_v2 = vpop.f32.mrf.mxu2  ;;  %2654 = vmatmul.msk.f32.gmra.mxu3 %vm121_vm1, %v1070_v55  ;;  %v1072_v55 = vrot.slane %v3689_v57, 1 }
 0x11e   :  { %2670 = vmatmul.msk.f32.gmra.mxu0 %vm121_vm1, %v3341_v32  ;;  %v679_v17 = vadd.f32 %v645_v2, %v495_v26 }
 0x120   :  { %v737_v4 = vpop.f32.mrf.mxu3 }
 0x121   :  { %v3595_v21 = vadd.f32 %v737_v4, %v679_v17 }
 0x122   :  { %2637 = vmatmul.msk.f32.gmra.mxu2 %vm121_vm1, %v3055_v27 }
 0x123   :  { %v3599_v54 = vpop.f32.mrf.mxu0 }
 0x125   :  { %v648_v28 = vpop.f32.mrf.mxu2  ;;  %2655 = vmatmul.msk.f32.gmra.mxu3 %vm121_vm1, %v3079_v37 }
 0x126   :  { %2671 = vmatmul.msk.f32.gmra.mxu0 %vm121_vm1, %v3367_v18  ;;  %v680_v32 = vadd.f32 %v648_v28, %v498_v52 }
 0x128   :  { %v740_v41 = vpop.f32.mrf.mxu3 }
 0x129   :  { %v3606_v58 = vadd.f32 %v740_v41, %v680_v32  ;;  %v2734_v41 = vld [vmem:[%s4545_s3 + $0x38] sm:$0xff] }
 0x12a   :  { %2638 = vmatmul.msk.f32.gmra.mxu2 %vm121_vm1, %v3073_v35  ;;  %1861 = vmatpush.msrb.mxu0 %v2734_v41 }
 0x12b   :  { %v3610_v27 = vpop.f32.mrf.mxu0 }
 0x12d   :  { %v3613_v34 = vpop.f32.mrf.mxu2  ;;  %2656 = vmatmul.msk.f32.gmra.mxu3 %vm121_vm1, %v3107_v47 }
 0x12e   :  { %2672 = vmatmul.msk.f32.gmra.mxu0 %vm121_vm1, %v1166_v44 }
 0x130   :  { %v3618_v37 = vpop.f32.mrf.mxu3 }
 0x132   :  { %2639 = vmatmul.msk.f32.gmra.mxu2 %vm121_vm1, %v3109_v48 }
 0x133   :  { %v3622_v18 = vpop.f32.mrf.mxu0 }
 0x135   :  { %v3624_v62 = vpop.f32.mrf.mxu2  ;;  %2657 = vmatmul.msk.f32.gmra.mxu3 %vm121_vm1, %v3140_v61 }
 0x136   :  { %2673 = vmatmul.msk.f32.gmra.mxu0 %vm121_vm1, %v3388_v22 }
 0x138   :  { %v3630_v35 = vpop.f32.mrf.mxu3 }
 0x13a   :  { %2640 = vmatmul.msk.f32.gmra.mxu2 %vm121_vm1, %v3147_v63 }
 0x13b   :  { %v3634_v47 = vpop.f32.mrf.mxu0 }
 0x13d   :  { %v3636_v0 = vpop.f32.mrf.mxu2  ;;  %2658 = vmatmul.msk.f32.gmra.mxu3 %vm121_vm1, %v3166_v10  ;;  %v3656_v10 = vpop.f32.mrf.mxu1 }
 0x13e   :  { %2674 = vmatmul.msk.f32.gmra.mxu0 %vm121_vm1, %v3405_v43 }
 0x140   :  { %v3642_v48 = vpop.f32.mrf.mxu3 }
 0x142   :  { %2641 = vmatmul.msk.f32.gmra.mxu2 %vm121_vm1, %v3176_v14 }
 0x143   :  { %v3646_v61 = vpop.f32.mrf.mxu0 }
 0x145   :  { %v3648_v22 = vpop.f32.mrf.mxu2  ;;  %2659 = vmatmul.msk.f32.gmra.mxu3 %vm121_vm1, %v3200_v23  ;;  %v1396_v23 = vld [vmem:[%s4545_s3 + $0x8] sm:$0xff]  ;;  %v3693_v3 = vpop.f32.mrf.mxu1 }
 0x146   :  { %2675 = vmatmul.msk.f32.gmra.mxu0 %vm121_vm1, %v3423_v59  ;;  %v4556_v59 = vmov 0.0   ;;  %1623 = vmatpush.msrb.mxu2 %v1396_v23 }
 0x147   :  { %1300 = vst.msk [vmem:[#allocation3 + $0x10] sm:$0xff] %vm1296_vm5, %v4556_v59 }
 0x148   :  { %v3654_v63 = vpop.f32.mrf.mxu3  ;;  %1301 = vst.msk [vmem:[#allocation3 + $0x18] sm:$0x3] %vm1298_vm6, %v4556_v59  ;;  %1624 = vmatpush.msrb.mxu2 %v1395_v36 }
 0x149   :  { %1297 = vst.msk [vmem:[#allocation3] sm:$0xff] %vm1296_vm5, %v4556_v59 }
 0x14a   :  { %2642 = vmatmul.msk.f32.gmra.mxu2 %vm121_vm1, %v3207_v25  ;;  %1299 = vst.msk [vmem:[#allocation3 + $0x8] sm:$0x3] %vm1298_vm6, %v4556_v59 }
 0x14b   :  { %v3660_v43 = vpop.f32.mrf.mxu0  ;;  %1302 = vst.msk [vmem:[#allocation3 + $0x20] sm:$0xff] %vm1296_vm5, %v4556_v59 }
 0x14c   :  { %1303 = vst.msk [vmem:[#allocation3 + $0x28] sm:$0x3] %vm1298_vm6, %v4556_v59 }
 0x14d   :  { %v3662_v14 = vpop.f32.mrf.mxu2  ;;  %2660 = vmatmul.msk.f32.gmra.mxu3 %vm121_vm1, %v3234_v45  ;;  %1304 = vst.msk [vmem:[#allocation3 + $0x30] sm:$0xff] %vm1296_vm5, %v4556_v59  ;;  %v3744_v32 = vpop.f32.mrf.mxu1 }
 0x14e   :  { %2676 = vmatmul.msk.f32.gmra.mxu0 %vm121_vm1, %v3440_v11  ;;  %v3687_v11 = vld [vmem:[#allocation2 + $0x130] sm:$0xff]  ;;  %1305 = vst.msk [vmem:[#allocation3 + $0x38] sm:$0x3] %vm1298_vm6, %v4556_v59 }
 0x14f   :  { %v1071_v12 = vrot.slane %v3687_v11, 1  ;;  %1306 = vst.msk [vmem:[#allocation3 + $0x40] sm:$0xff] %vm1296_vm5, %v4556_v59 }
 0x150   :  { %v3675_v25 = vpop.f32.mrf.mxu3  ;;  %1307 = vst.msk [vmem:[#allocation3 + $0x48] sm:$0x3] %vm1298_vm6, %v4556_v59 }
 0x151   :  { %1308 = vst.msk [vmem:[#allocation3 + $0x50] sm:$0xff] %vm1296_vm5, %v4556_v59  ;;  %v1356_v2 = vld [vmem:[#allocation3 + $0x8] sm:$0x3]  ;;  %v1073_v17 = vsel %vm269_vm3, %v1071_v12, %v1072_v55  ;;  %v1167_v55 = vrot.slane %v3687_v11, 2 }
 0x152   :  { %2643 = vmatmul.msk.f32.gmra.mxu2 %vm121_vm1, %v3480_v30  ;;  %v2716_v30 = vld [vmem:[%s4545_s3 + $0x28] sm:$0xff]  ;;  %1309 = vst.msk [vmem:[#allocation3 + $0x58] sm:$0x3] %vm1298_vm6, %v4556_v59  ;;  %v1430_v4 = vrot.slane %v1356_v2, 1  ;;  %v1675_v46 = vrot.slane %v1356_v2, 2 }
 0x153   :  { %v3685_v45 = vpop.f32.mrf.mxu0  ;;  %1771 = vmatpush.msrb.mxu3 %v2716_v30  ;;  %1310 = vst.msk [vmem:[#allocation3 + $0x60] sm:$0xff] %vm1296_vm5, %v4556_v59  ;;  %v2752_v30 = vld [vmem:[%s4545_s3 + $0x48] sm:$0xff] }
 0x154   :  { %1311 = vst.msk [vmem:[#allocation3 + $0x68] sm:$0x3] %vm1298_vm6, %v4556_v59  ;;  %1957 = vmatpush.msrb.mxu1 %v2752_v30  ;;  %v864_v30 = vadd.f32 %v3553_v16, %v3538_v42 }
 0x155   :  { %v3697_v5 = vpop.f32.mrf.mxu2  ;;  %2661 = vmatmul.msk.f32.gmra.mxu3 %vm121_vm1, %v3518_v50  ;;  %v2715_v50 = vld [vmem:[%s4545_s3 + $0x20] sm:$0xff]  ;;  %1312 = vst.msk [vmem:[#allocation3 + $0x70] sm:$0xff] %vm1296_vm5, %v4556_v59  ;;  %v919_v2 = vpop.f32.mrf.mxu1 }
 0x156   :  { %2677 = vmatmul.msk.f32.gmra.mxu0 %vm121_vm1, %v3457_v40  ;;  %1772 = vmatpush.msrb.mxu3 %v2715_v50  ;;  %v1355_v40 = vld [vmem:[#allocation3] sm:$0xff]  ;;  %1313 = vst.msk [vmem:[#allocation3 + $0x78] sm:$0x3] %vm1298_vm6, %v4556_v59  ;;  %v1168_v50 = vrot.slane %v3689_v57, 2 }
 0x157   :  { %v1429_v6 = vrot.slane %v1355_v40, 1  ;;  %1314 = vst.msk [vmem:[#allocation3 + $0x80] sm:$0xff] %vm1296_vm5, %v4556_v59  ;;  %v1674_v39 = vrot.slane %v1355_v40, 2 }
 0x158   :  { %v3720_v26 = vpop.f32.mrf.mxu3  ;;  %1315 = vst.msk [vmem:[#allocation3 + $0x88] sm:$0x3] %vm1298_vm6, %v4556_v59 }
 0x159   :  { %v1431_v52 = vsel %vm269_vm3, %v1429_v6, %v1430_v4  ;;  %1316 = vst.msk [vmem:[#allocation3 + $0x90] sm:$0xff] %vm1296_vm5, %v4556_v59  ;;  %v1676_v23 = vsel %vm521_vm4, %v1674_v39, %v1675_v46  ;;  %v863_v6 = vadd.f32 %v3542_v1, %v3527_v7  ;;  %v3820_v39 = vld [vmem:[%s4544_s2] ss:$0 sm:$0xff] }
 0x15a   :  { %2644 = vmatmul.msk.f32.gmra.mxu2 %vm121_vm1, %v3687_v11  ;;  %2683 = vmatmul.msk.f32.vlgmr.msra.gmra.mxu1 %vm1296_vm5, %v1431_v52  ;;  %1317 = vst.msk [vmem:[#allocation3 + $0x98] sm:$0x3] %vm1298_vm6, %v4556_v59  ;;  %v1169_v11 = vsel %vm521_vm4, %v1167_v55, %v1168_v50 }
 0x15b   :  { %v3731_v24 = vpop.f32.mrf.mxu0  ;;  %1318 = vst.msk [vmem:[#allocation3 + $0xa0] sm:$0xff] %vm1296_vm5, %v4556_v59  ;;  %v959_v7 = vadd.f32 %v3693_v3, %v863_v6  ;;  %v960_v3 = vadd.f32 %v3744_v32, %v864_v30 }
 0x15c   :  { %1319 = vst.msk [vmem:[#allocation3 + $0xa8] sm:$0x3] %vm1298_vm6, %v4556_v59 }
 0x15d   :  { %v3738_v28 = vpop.f32.mrf.mxu2  ;;  %2662 = vmatmul.msk.f32.gmra.mxu3 %vm121_vm1, %v1073_v17  ;;  %1320 = vst.msk [vmem:[#allocation3 + $0xb0] sm:$0xff] %vm1296_vm5, %v4556_v59  ;;  %v922_v4 = vpop.f32.mrf.mxu1 }
 0x15e   :  { %2678 = vmatmul.msk.f32.gmra.mxu0 %vm121_vm1, %v3474_v51  ;;  %v2733_v51 = vld [vmem:[%s4545_s3 + $0x30] sm:$0xff]  ;;  %1321 = vst.msk [vmem:[#allocation3 + $0xb8] sm:$0x3] %vm1298_vm6, %v4556_v59 }
 0x15f   :  { %1862 = vmatpush.msrb.mxu0 %v2733_v51  ;;  %1322 = vst.msk [vmem:[#allocation3 + $0xc0] sm:$0xff] %vm1296_vm5, %v4556_v59 }
 0x160   :  { %v3755_v44 = vpop.f32.mrf.mxu3  ;;  %1323 = vst.msk [vmem:[#allocation3 + $0xc8] sm:$0x3] %vm1298_vm6, %v4556_v59 }
 0x161   :  { %1324 = vst.msk [vmem:[#allocation3 + $0xd0] sm:$0xff] %vm1296_vm5, %v4556_v59 }
 0x162   :  { %2699 = vmatmul.msk.f32.vlgmr.msrb.gmra.mxu2 %vm1296_vm5, %v1355_v40  ;;  %v862_v40 = vadd.f32 %v3531_v38, %v3511_v19  ;;  %1325 = vst.msk [vmem:[#allocation3 + $0xd8] sm:$0x3] %vm1298_vm6, %v4556_v59 }
 0x163   :  { %v3771_v36 = vpop.f32.mrf.mxu0  ;;  %1326 = vst.msk [vmem:[#allocation3 + $0xe0] sm:$0xff] %vm1296_vm5, %v4556_v59 }
 0x164   :  { %1327 = vst.msk [vmem:[#allocation3 + $0xe8] sm:$0x3] %vm1298_vm6, %v4556_v59  ;;  %v958_v19 = vadd.f32 %v3656_v10, %v862_v40 }
 0x165   :  { %v1002_v12 = vpop.f32.mrf.mxu2  ;;  %2717 = vmatmul.msk.f32.vlgmr.msrb.gmra.mxu3 %vm1296_vm5, %v1676_v23  ;;  %1328 = vst.msk [vmem:[#allocation3 + $0xf0] sm:$0xff] %vm1296_vm5, %v4556_v59 }
 0x166   :  { %2679 = vmatmul.msk.f32.gmra.mxu0 %vm121_vm1, %v3509_v15  ;;  %1329 = vst.msk [vmem:[#allocation3 + $0xf8] sm:$0x3] %vm1298_vm6, %v4556_v59  ;;  %v1050_v57 = vadd.f32 %v1002_v12, %v958_v19 }
 0x167   :  { %1330 = vst.msk [vmem:[#allocation3 + $0x100] sm:$0xff] %vm1296_vm5, %v4556_v59 }
 0x168   :  { %v1100_v17 = vpop.f32.mrf.mxu3  ;;  %1331 = vst.msk [vmem:[#allocation3 + $0x108] sm:$0x3] %vm1298_vm6, %v4556_v59 }
 0x169   :  { %1332 = vst.msk [vmem:[#allocation3 + $0x110] sm:$0xff] %vm1296_vm5, %v4556_v59  ;;  %v1148_v52 = vadd.f32 %v1100_v17, %v1050_v57  ;;  %v3836_v17 = vpop.f32.mrf.mxu1  ;;  %v865_v57 = vadd.f32 %v3564_v31, %v3549_v13 }
 0x16a   :  { %1333 = vst.msk [vmem:[#allocation3 + $0x118] sm:$0x3] %vm1298_vm6, %v4556_v59 }
 0x16b   :  { %v3796_v15 = vpop.f32.mrf.mxu0  ;;  %1334 = vst.msk [vmem:[#allocation3 + $0x120] sm:$0xff] %vm1296_vm5, %v4556_v59 }
 0x16c   :  { %1335 = vst.msk [vmem:[#allocation3 + $0x128] sm:$0x3] %vm1298_vm6, %v4556_v59 }
 0x16d   :  { %v1005_v38 = vpop.f32.mrf.mxu2  ;;  %1336 = vst.msk [vmem:[#allocation3 + $0x130] sm:$0xff] %vm1296_vm5, %v4556_v59 }
 0x16e   :  { %2680 = vmatmul.msk.f32.gmra.mxu0 %vm121_vm1, %v1169_v11  ;;  %1337 = vst.msk [vmem:[#allocation3 + $0x138] sm:$0x3] %vm1298_vm6, %v4556_v59  ;;  %v1051_v51 = vadd.f32 %v1005_v38, %v959_v7 }
 0x170   :  { %v1103_v10 = vpop.f32.mrf.mxu3 }
 0x171   :  { %v1149_v50 = vadd.f32 %v1103_v10, %v1051_v51 }
 0x173   :  { %v1196_v46 = vpop.f32.mrf.mxu0 }
 0x174   :  { %v1244_v1 = vadd.f32 %v1196_v46, %v1148_v52 }
 0x175   :  { %v1008_v41 = vpop.f32.mrf.mxu2 }
 0x176   :  { %v1264_v23 = vadd.f32 %v3820_v39, %v1244_v1  ;;  %v1052_v19 = vadd.f32 %v1008_v41, %v960_v3  ;;  %v961_v41 = vadd.f32 %v919_v2, %v865_v57 }
 0x178   :  { %v1280_v12 = vmax.f32 %v1264_v23, 0.0  ;;  %v1106_v55 = vpop.f32.mrf.mxu3 }
 0x179   :  { %v1150_v16 = vadd.f32 %v1106_v55, %v1052_v19  ;;  %v3854_v55 = vpop.f32.mrf.mxu1 }
 0x17a   :  { %1339 = vst.msk [vmem:[#allocation3 + $0x11] sm:$0xff] %vm1296_vm5, %v1280_v12 }
 0x17b   :  { %v1199_v40 = vpop.f32.mrf.mxu0 }
 0x17c   :  { %v1245_v11 = vadd.f32 %v1199_v40, %v1149_v50  ;;  %v866_v50 = vadd.f32 %v3575_v49, %v3560_v9 }
 0x17d   :  { %v1011_v59 = vpop.f32.mrf.mxu2 }
 0x17e   :  { %v1265_v38 = vadd.f32 %v3820_v39, %v1245_v11  ;;  %v1053_v30 = vadd.f32 %v1011_v59, %v961_v41  ;;  %v962_v49 = vadd.f32 %v922_v4, %v866_v50  ;;  %v867_v4 = vadd.f32 %v3586_v60, %v3571_v33 }
 0x180   :  { %v1281_v6 = vmax.f32 %v1265_v38, 0.0  ;;  %v1109_v42 = vpop.f32.mrf.mxu3 }
 0x181   :  { %v1357_v52 = vld [vmem:[#allocation3 + $0x10] sm:$0xff]  ;;  %v1358_v10 = vld [vmem:[#allocation3 + $0x18] sm:$0x3]  ;;  %v1151_v11 = vadd.f32 %v1109_v42, %v1053_v30 }
 0x182   :  { %1340 = vst.msk [vmem:[#allocation3 + $0x21] sm:$0xff] %vm1296_vm5, %v1281_v6  ;;  %v1432_v46 = vrot.slane %v1357_v52, 1  ;;  %2700 = vmatmul.msk.f32.gmra.mxu2 %vm1296_vm5, %v1357_v52  ;;  %v1677_v32 = vrot.slane %v1357_v52, 2  ;;  %2735 = vmatmul.msk.f32.vlgmr.msrb.gmra.mxu0 %vm1296_vm5, %v1357_v52  ;;  %v1433_v7 = vrot.slane %v1358_v10, 1  ;;  %v1678_v1 = vrot.slane %v1358_v10, 2 }
 0x183   :  { %v1202_v51 = vpop.f32.mrf.mxu0 }
 0x184   :  { %v1246_v23 = vadd.f32 %v1202_v51, %v1150_v16  ;;  %v3845_v13 = vsel %vm269_vm3, %v1432_v46, %v1433_v7  ;;  %v3848_v31 = vsel %vm521_vm4, %v1677_v32, %v1678_v1  ;;  %v931_v1 = vpop.f32.mrf.mxu1 }
 0x185   :  { %2684 = vmatmul.msk.f32.gmra.mxu1 %vm1296_vm5, %v3845_v13  ;;  %2718 = vmatmul.msk.f32.gmra.mxu3 %vm1296_vm5, %v3848_v31  ;;  %v1014_v12 = vpop.f32.mrf.mxu2 }
 0x186   :  { %v1266_v2 = vadd.f32 %v3820_v39, %v1246_v23  ;;  %v1054_v46 = vadd.f32 %v1014_v12, %v962_v49 }
 0x188   :  { %v1282_v3 = vmax.f32 %v1266_v2, 0.0  ;;  %v1112_v40 = vpop.f32.mrf.mxu3 }
 0x189   :  { %v3859_v19 = vld [vmem:[#allocation3 + $0x20] sm:$0xff]  ;;  %v1360_v59 = vld [vmem:[#allocation3 + $0x28] sm:$0x3]  ;;  %v1152_v23 = vadd.f32 %v1112_v40, %v1054_v46 }
 0x18a   :  { %1341 = vst.msk [vmem:[#allocation3 + $0x31] sm:$0xff] %vm1296_vm5, %v1282_v3  ;;  %2701 = vmatmul.msk.f32.gmra.mxu2 %vm1296_vm5, %v3859_v19  ;;  %2736 = vmatmul.msk.f32.gmra.mxu0 %vm1296_vm5, %v3859_v19  ;;  %v1435_v38 = vrot.slane %v3859_v19, 1  ;;  %v1436_v57 = vrot.slane %v1360_v59, 1  ;;  %v1680_v6 = vrot.slane %v3859_v19, 2  ;;  %v1681_v9 = vrot.slane %v1360_v59, 2 }
 0x18b   :  { %v1205_v16 = vpop.f32.mrf.mxu0  ;;  %v963_v3 = vadd.f32 %v3836_v17, %v867_v4  ;;  %v868_v17 = vadd.f32 %v3599_v54, %v3582_v29 }
 0x18c   :  { %v1247_v42 = vadd.f32 %v1205_v16, %v1151_v11  ;;  %v3869_v52 = vsel %vm269_vm3, %v1435_v38, %v1436_v57  ;;  %v3872_v10 = vsel %vm521_vm4, %v1680_v6, %v1681_v9  ;;  %v934_v4 = vpop.f32.mrf.mxu1 }
 0x18d   :  { %2685 = vmatmul.msk.f32.gmra.mxu1 %vm1296_vm5, %v3869_v52  ;;  %2719 = vmatmul.msk.f32.gmra.mxu3 %vm1296_vm5, %v3872_v10  ;;  %v1017_v32 = vpop.f32.mrf.mxu2 }
 0x18e   :  { %v1267_v7 = vadd.f32 %v3820_v39, %v1247_v42  ;;  %v1055_v57 = vadd.f32 %v1017_v32, %v963_v3 }
 0x190   :  { %v1283_v41 = vmax.f32 %v1267_v7, 0.0  ;;  %v1115_v51 = vpop.f32.mrf.mxu3 }
 0x191   :  { %v3881_v30 = vld [vmem:[#allocation3 + $0x30] sm:$0xff]  ;;  %v1362_v2 = vld [vmem:[#allocation3 + $0x38] sm:$0x3]  ;;  %v1153_v42 = vadd.f32 %v1115_v51, %v1055_v57  ;;  %v964_v51 = vadd.f32 %v3854_v55, %v868_v17  ;;  %v869_v55 = vadd.f32 %v3610_v27, %v3595_v21  ;;  %v2751_v27 = vld [vmem:[%s4545_s3 + $0x40] sm:$0xff] }
 0x192   :  { %1342 = vst.msk [vmem:[#allocation3 + $0x41] sm:$0xff] %vm1296_vm5, %v1283_v41  ;;  %2702 = vmatmul.msk.f32.gmra.mxu2 %vm1296_vm5, %v3881_v30  ;;  %2737 = vmatmul.msk.f32.gmra.mxu0 %vm1296_vm5, %v3881_v30  ;;  %v1438_v12 = vrot.slane %v3881_v30, 1  ;;  %v1439_v50 = vrot.slane %v1362_v2, 1  ;;  %v1683_v33 = vrot.slane %v3881_v30, 2  ;;  %v1684_v60 = vrot.slane %v1362_v2, 2 }
 0x193   :  { %v1208_v40 = vpop.f32.mrf.mxu0  ;;  %1958 = vmatpush.msrb.mxu1 %v2751_v27 }
 0x194   :  { %v1248_v11 = vadd.f32 %v1208_v40, %v1152_v23  ;;  %v3892_v59 = vsel %vm269_vm3, %v1438_v12, %v1439_v50  ;;  %v3895_v38 = vsel %vm521_vm4, %v1683_v33, %v1684_v60 }
 0x195   :  { %2686 = vmatmul.msk.f32.gmra.mxu1 %vm1296_vm5, %v3892_v59  ;;  %2720 = vmatmul.msk.f32.gmra.mxu3 %vm1296_vm5, %v3895_v38  ;;  %v1020_v6 = vpop.f32.mrf.mxu2 }
 0x196   :  { %v1268_v9 = vadd.f32 %v3820_v39, %v1248_v11  ;;  %v1056_v33 = vadd.f32 %v1020_v6, %v964_v51 }
 0x198   :  { %v1284_v49 = vmax.f32 %v1268_v9, 0.0  ;;  %v1118_v16 = vpop.f32.mrf.mxu3 }
 0x199   :  { %v3904_v46 = vld [vmem:[#allocation3 + $0x40] sm:$0xff]  ;;  %v1364_v7 = vld [vmem:[#allocation3 + $0x48] sm:$0x3]  ;;  %v1154_v57 = vadd.f32 %v1118_v16, %v1056_v33  ;;  %v965_v16 = vadd.f32 %v931_v1, %v869_v55  ;;  %v870_v33 = vadd.f32 %v3622_v18, %v3606_v58 }
 0x19a   :  { %1343 = vst.msk [vmem:[#allocation3 + $0x51] sm:$0xff] %vm1296_vm5, %v1284_v49  ;;  %2703 = vmatmul.msk.f32.gmra.mxu2 %vm1296_vm5, %v3904_v46  ;;  %2738 = vmatmul.msk.f32.gmra.mxu0 %vm1296_vm5, %v3904_v46  ;;  %v1441_v32 = vrot.slane %v3904_v46, 1  ;;  %v1442_v41 = vrot.slane %v1364_v7, 1  ;;  %v1686_v29 = vrot.slane %v3904_v46, 2  ;;  %v1687_v54 = vrot.slane %v1364_v7, 2 }
 0x19b   :  { %v1211_v23 = vpop.f32.mrf.mxu0 }
 0x19c   :  { %v1249_v2 = vadd.f32 %v1211_v23, %v1153_v42  ;;  %v3915_v12 = vsel %vm269_vm3, %v1441_v32, %v1442_v41  ;;  %v3918_v50 = vsel %vm521_vm4, %v1686_v29, %v1687_v54  ;;  %v937_v32 = vpop.f32.mrf.mxu1 }
 0x19d   :  { %2687 = vmatmul.msk.f32.gmra.mxu1 %vm1296_vm5, %v3915_v12  ;;  %2721 = vmatmul.msk.f32.gmra.mxu3 %vm1296_vm5, %v3918_v50  ;;  %v1023_v60 = vpop.f32.mrf.mxu2 }
 0x19e   :  { %v1269_v3 = vadd.f32 %v3820_v39, %v1249_v2  ;;  %v1057_v51 = vadd.f32 %v1023_v60, %v965_v16  ;;  %v501_v2 = vadd.f32 %v3375_v20, %v3385_v53 }
 0x1a0   :  { %v1285_v40 = vmax.f32 %v1269_v3, 0.0  ;;  %v1121_v11 = vpop.f32.mrf.mxu3 }
 0x1a1   :  { %v3927_v9 = vld [vmem:[#allocation3 + $0x50] sm:$0xff]  ;;  %v1366_v17 = vld [vmem:[#allocation3 + $0x58] sm:$0x3]  ;;  %v1155_v60 = vadd.f32 %v1121_v11, %v1057_v51 }
 0x1a2   :  { %1344 = vst.msk [vmem:[#allocation3 + $0x61] sm:$0xff] %vm1296_vm5, %v1285_v40  ;;  %2704 = vmatmul.msk.f32.gmra.mxu2 %vm1296_vm5, %v3927_v9  ;;  %2739 = vmatmul.msk.f32.gmra.mxu0 %vm1296_vm5, %v3927_v9  ;;  %v1444_v6 = vrot.slane %v3927_v9, 1  ;;  %v1445_v49 = vrot.slane %v1366_v17, 1  ;;  %v1689_v42 = vrot.slane %v3927_v9, 2  ;;  %v1690_v21 = vrot.slane %v1366_v17, 2 }
 0x1a3   :  { %v1214_v7 = vpop.f32.mrf.mxu0  ;;  %v681_v40 = vadd.f32 %v3613_v34, %v501_v2  ;;  %v682_v2 = vadd.f32 %v3624_v62, %v3408_v56  ;;  %v1376_v62 = vld [vmem:[#allocation3 + $0xa8] sm:$0x3] }
 0x1a4   :  { %v1250_v41 = vadd.f32 %v1214_v7, %v1154_v57  ;;  %v3940_v29 = vsel %vm269_vm3, %v1444_v6, %v1445_v49  ;;  %v3943_v54 = vsel %vm521_vm4, %v1689_v42, %v1690_v21  ;;  %v966_v6 = vadd.f32 %v934_v4, %v870_v33  ;;  %v940_v7 = vpop.f32.mrf.mxu1 }
 0x1a5   :  { %2688 = vmatmul.msk.f32.gmra.mxu1 %vm1296_vm5, %v3940_v29  ;;  %2722 = vmatmul.msk.f32.gmra.mxu3 %vm1296_vm5, %v3943_v54  ;;  %v1026_v23 = vpop.f32.mrf.mxu2  ;;  %v773_v16 = vadd.f32 %v3618_v37, %v681_v40 }
 0x1a6   :  { %v1270_v1 = vadd.f32 %v3820_v39, %v1250_v41  ;;  %v1058_v21 = vadd.f32 %v1026_v23, %v966_v6 }
 0x1a7   :  { %v871_v41 = vadd.f32 %v3634_v47, %v773_v16  ;;  %v1454_v16 = vrot.slane %v1376_v62, 1 }
 0x1a8   :  { %v1286_v3 = vmax.f32 %v1270_v1, 0.0  ;;  %v1124_v55 = vpop.f32.mrf.mxu3 }
 0x1a9   :  { %v3955_v57 = vld [vmem:[#allocation3 + $0x60] sm:$0xff]  ;;  %v1368_v17 = vld [vmem:[#allocation3 + $0x68] sm:$0x3]  ;;  %v1156_v23 = vadd.f32 %v1124_v55, %v1058_v21  ;;  %v967_v55 = vadd.f32 %v937_v32, %v871_v41 }
 0x1aa   :  { %1345 = vst.msk [vmem:[#allocation3 + $0x71] sm:$0xff] %vm1296_vm5, %v1286_v3  ;;  %2705 = vmatmul.msk.f32.gmra.mxu2 %vm1296_vm5, %v3955_v57  ;;  %2740 = vmatmul.msk.f32.gmra.mxu0 %vm1296_vm5, %v3955_v57  ;;  %v1447_v20 = vrot.slane %v3955_v57, 1  ;;  %v1448_v53 = vrot.slane %v1368_v17, 1  ;;  %v1692_v58 = vrot.slane %v3955_v57, 2  ;;  %v1693_v18 = vrot.slane %v1368_v17, 2  ;;  %v1375_v17 = vld [vmem:[#allocation3 + $0xa0] sm:$0xff] }
 0x1ab   :  { %v1217_v34 = vpop.f32.mrf.mxu0 }
 0x1ac   :  { %v1251_v11 = vadd.f32 %v1217_v34, %v1155_v60  ;;  %v3965_v49 = vsel %vm269_vm3, %v1447_v20, %v1448_v53  ;;  %v3968_v42 = vsel %vm521_vm4, %v1692_v58, %v1693_v18  ;;  %v774_v18 = vadd.f32 %v3630_v35, %v682_v2 }
 0x1ad   :  { %2689 = vmatmul.msk.f32.gmra.mxu1 %vm1296_vm5, %v3965_v49  ;;  %2723 = vmatmul.msk.f32.gmra.mxu3 %vm1296_vm5, %v3968_v42  ;;  %v1029_v27 = vpop.f32.mrf.mxu2  ;;  %v1453_v34 = vrot.slane %v1375_v17, 1  ;;  %v683_v35 = vadd.f32 %v3636_v0, %v3425_v8 }
 0x1ae   :  { %v1271_v4 = vadd.f32 %v3820_v39, %v1251_v11  ;;  %v1698_v11 = vrot.slane %v1375_v17, 2  ;;  %v1059_v21 = vadd.f32 %v1029_v27, %v967_v55  ;;  %v872_v41 = vadd.f32 %v3646_v61, %v774_v18 }
 0x1af   :  { %v1455_v27 = vsel %vm269_vm3, %v1453_v34, %v1454_v16 }
 0x1b0   :  { %v1287_v51 = vmax.f32 %v1271_v4, 0.0  ;;  %v1127_v1 = vpop.f32.mrf.mxu3  ;;  %v1699_v4 = vrot.slane %v1376_v62, 2 }
 0x1b1   :  { %v3979_v33 = vld [vmem:[#allocation3 + $0x70] sm:$0xff]  ;;  %v1370_v3 = vld [vmem:[#allocation3 + $0x78] sm:$0x3] }
 0x1b2   :  { %1346 = vst.msk [vmem:[#allocation3 + $0x81] sm:$0xff] %vm1296_vm5, %v1287_v51  ;;  %2706 = vmatmul.msk.f32.gmra.mxu2 %vm1296_vm5, %v3979_v33  ;;  %2741 = vmatmul.msk.f32.gmra.mxu0 %vm1296_vm5, %v3979_v33  ;;  %v1450_v37 = vrot.slane %v3979_v33, 1  ;;  %v1451_v47 = vrot.slane %v1370_v3, 1  ;;  %v1695_v40 = vrot.slane %v3979_v33, 2  ;;  %v1696_v60 = vrot.slane %v1370_v3, 2  ;;  %v943_v51 = vpop.f32.mrf.mxu1 }
 0x1b3   :  { %v1220_v56 = vpop.f32.mrf.mxu0  ;;  %v1700_v61 = vsel %vm521_vm4, %v1698_v11, %v1699_v4 }
 0x1b4   :  { %v1252_v20 = vadd.f32 %v1220_v56, %v1156_v23  ;;  %v3989_v53 = vsel %vm269_vm3, %v1450_v37, %v1451_v47  ;;  %v3992_v58 = vsel %vm521_vm4, %v1695_v40, %v1696_v60  ;;  %v1157_v37 = vadd.f32 %v1127_v1, %v1059_v21 }
 0x1b5   :  { %2690 = vmatmul.msk.f32.gmra.mxu1 %vm1296_vm5, %v3989_v53  ;;  %2724 = vmatmul.msk.f32.gmra.mxu3 %vm1296_vm5, %v3992_v58  ;;  %v1032_v6 = vpop.f32.mrf.mxu2  ;;  %v968_v47 = vadd.f32 %v940_v7, %v872_v41  ;;  %v775_v56 = vadd.f32 %v3642_v48, %v683_v35 }
 0x1b6   :  { %v1272_v32 = vadd.f32 %v3820_v39, %v1252_v20  ;;  %v4557_v20 = vld [vmem:[#allocation5_spill] sm:$0xff] }
 0x1b7   :  { %v1060_v8 = vadd.f32 %v1032_v6, %v968_v47  ;;  %v684_v18 = vadd.f32 %v3648_v22, %v4557_v20 }
 0x1b8   :  { %v1288_v23 = vmax.f32 %v1272_v32, 0.0  ;;  %v1130_v3 = vpop.f32.mrf.mxu3 }
 0x1b9   :  { %v4003_v2 = vld [vmem:[#allocation3 + $0x80] sm:$0xff]  ;;  %v1158_v7 = vadd.f32 %v1130_v3, %v1060_v8  ;;  %v776_v3 = vadd.f32 %v3654_v63, %v684_v18 }
 0x1ba   :  { %1347 = vst.msk [vmem:[#allocation3 + $0xb1] sm:$0xff] %vm1296_vm5, %v1288_v23  ;;  %2707 = vmatmul.msk.f32.gmra.mxu2 %vm1296_vm5, %v1375_v17  ;;  %2742 = vmatmul.msk.f32.gmra.mxu0 %vm1296_vm5, %v4003_v2  ;;  %v873_v17 = vadd.f32 %v3660_v43, %v775_v56  ;;  %v946_v21 = vpop.f32.mrf.mxu1 }
 0x1bb   :  { %v1223_v40 = vpop.f32.mrf.mxu0 }
 0x1bc   :  { %v1253_v60 = vadd.f32 %v1223_v40, %v1157_v37  ;;  %v969_v43 = vadd.f32 %v943_v51, %v873_v17  ;;  %v4558_v40 = vld [vmem:[#allocation6_spill] sm:$0xff] }
 0x1bd   :  { %2691 = vmatmul.msk.f32.gmra.mxu1 %vm1296_vm5, %v1455_v27  ;;  %2725 = vmatmul.msk.f32.gmra.mxu3 %vm1296_vm5, %v1700_v61  ;;  %v1035_v0 = vpop.f32.mrf.mxu2  ;;  %v874_v27 = vadd.f32 %v3685_v45, %v776_v3 }
 0x1be   :  { %v1273_v1 = vadd.f32 %v3820_v39, %v1253_v60  ;;  %v1061_v35 = vadd.f32 %v1035_v0, %v969_v43  ;;  %v685_v60 = vadd.f32 %v3662_v14, %v4558_v40 }
 0x1c0   :  { %v1289_v62 = vmax.f32 %v1273_v1, 0.0  ;;  %v1133_v55 = vpop.f32.mrf.mxu3 }
 0x1c1   :  { %v1377_v34 = vld [vmem:[#allocation3 + $0xb0] sm:$0xff]  ;;  %v1378_v11 = vld [vmem:[#allocation3 + $0xb8] sm:$0x3]  ;;  %v1159_v56 = vadd.f32 %v1133_v55, %v1061_v35 }
 0x1c2   :  { %1348 = vst.msk [vmem:[#allocation3 + $0xc1] sm:$0xff] %vm1296_vm5, %v1289_v62  ;;  %v1456_v48 = vrot.slane %v1377_v34, 1  ;;  %2708 = vmatmul.msk.f32.gmra.mxu2 %vm1296_vm5, %v1377_v34  ;;  %v1701_v6 = vrot.slane %v1377_v34, 2  ;;  %2743 = vmatmul.msk.f32.gmra.mxu0 %vm1296_vm5, %v1377_v34  ;;  %v1457_v32 = vrot.slane %v1378_v11, 1  ;;  %v1702_v16 = vrot.slane %v1378_v11, 2  ;;  %v949_v55 = vpop.f32.mrf.mxu1 }
 0x1c3   :  { %v1226_v4 = vpop.f32.mrf.mxu0  ;;  %v970_v62 = vadd.f32 %v946_v21, %v874_v27  ;;  %v777_v34 = vadd.f32 %v3675_v25, %v685_v60 }
 0x1c4   :  { %v1254_v41 = vadd.f32 %v1226_v4, %v1158_v7  ;;  %v4022_v23 = vsel %vm269_vm3, %v1456_v48, %v1457_v32  ;;  %v4025_v22 = vsel %vm521_vm4, %v1701_v6, %v1702_v16  ;;  %v4559_v16 = vld [vmem:[#allocation7_spill] sm:$0xff] }
 0x1c5   :  { %2692 = vmatmul.msk.f32.gmra.mxu1 %vm1296_vm5, %v4022_v23  ;;  %2726 = vmatmul.msk.f32.gmra.mxu3 %vm1296_vm5, %v4025_v22  ;;  %v1038_v37 = vpop.f32.mrf.mxu2  ;;  %v875_v6 = vadd.f32 %v3731_v24, %v777_v34  ;;  %v686_v43 = vadd.f32 %v3697_v5, %v4559_v16  ;;  %v2770_v5 = vld [vmem:[%s4545_s3 + $0x58] sm:$0xff] }
 0x1c6   :  { %v1274_v51 = vadd.f32 %v3820_v39, %v1254_v41  ;;  %v1062_v11 = vadd.f32 %v1038_v37, %v970_v62  ;;  %2051 = vmatpush.msra.mxu2 %v2770_v5  ;;  %v2824_v5 = vld [vmem:[%s4545_s3 + $0x88] sm:$0xff] }
 0x1c7   :  { %v971_v27 = vadd.f32 %v949_v55, %v875_v6  ;;  %2331 = vmatpush.msra.mxu1 %v2824_v5 }
 0x1c8   :  { %v1290_v61 = vmax.f32 %v1274_v51, 0.0  ;;  %v1136_v47 = vpop.f32.mrf.mxu3 }
 0x1c9   :  { %v4036_v8 = vld [vmem:[#allocation3 + $0xc0] sm:$0xff]  ;;  %v1380_v63 = vld [vmem:[#allocation3 + $0xc8] sm:$0x3]  ;;  %v1160_v4 = vadd.f32 %v1136_v47, %v1062_v11 }
 0x1ca   :  { %1349 = vst.msk [vmem:[#allocation3 + $0xd1] sm:$0xff] %vm1296_vm5, %v1290_v61  ;;  %2709 = vmatmul.msk.f32.gmra.mxu2 %vm1296_vm5, %v4036_v8  ;;  %2744 = vmatmul.msk.f32.gmra.mxu0 %vm1296_vm5, %v4036_v8  ;;  %v1459_v0 = vrot.slane %v4036_v8, 1  ;;  %v1460_v45 = vrot.slane %v1380_v63, 1  ;;  %v1704_v1 = vrot.slane %v4036_v8, 2  ;;  %v1705_v17 = vrot.slane %v1380_v63, 2  ;;  %v2788_v47 = vld [vmem:[%s4545_s3 + $0x68] sm:$0xff] }
 0x1cb   :  { %v1229_v14 = vpop.f32.mrf.mxu0  ;;  %2141 = vmatpush.msra.mxu3 %v2788_v47  ;;  %v778_v63 = vadd.f32 %v3720_v26, %v686_v43  ;;  %v4560_v26 = vld [vmem:[#allocation8_spill] sm:$0xff] }
 0x1cc   :  { %v1255_v20 = vadd.f32 %v1229_v14, %v1159_v56  ;;  %v4046_v18 = vsel %vm269_vm3, %v1459_v0, %v1460_v45  ;;  %v4049_v7 = vsel %vm521_vm4, %v1704_v1, %v1705_v17  ;;  %v2769_v45 = vld [vmem:[%s4545_s3 + $0x50] sm:$0xff]  ;;  %v952_v1 = vpop.f32.mrf.mxu1 }
 0x1cd   :  { %2693 = vmatmul.msk.f32.gmra.mxu1 %vm1296_vm5, %v4046_v18  ;;  %2727 = vmatmul.msk.f32.gmra.mxu3 %vm1296_vm5, %v4049_v7  ;;  %v1041_v48 = vpop.f32.mrf.mxu2  ;;  %v876_v62 = vadd.f32 %v3771_v36, %v778_v63 }
 0x1ce   :  { %v1275_v21 = vadd.f32 %v3820_v39, %v1255_v20  ;;  %v1063_v0 = vadd.f32 %v1041_v48, %v971_v27  ;;  %2052 = vmatpush.msra.mxu2 %v2769_v45  ;;  %v687_v20 = vadd.f32 %v3738_v28, %v4560_v26  ;;  %v2806_v28 = vld [vmem:[%s4545_s3 + $0x78] sm:$0xff] }
 0x1cf   :  { %v972_v16 = vadd.f32 %v952_v1, %v876_v62  ;;  %2237 = vmatpush.msra.mxu0 %v2806_v28 }
 0x1d0   :  { %v1291_v32 = vmax.f32 %v1275_v21, 0.0  ;;  %v1139_v3 = vpop.f32.mrf.mxu3 }
 0x1d1   :  { %v4060_v41 = vld [vmem:[#allocation3 + $0xd0] sm:$0xff]  ;;  %v1382_v25 = vld [vmem:[#allocation3 + $0xd8] sm:$0x3]  ;;  %v1161_v34 = vadd.f32 %v1139_v3, %v1063_v0 }
 0x1d2   :  { %1350 = vst.msk [vmem:[#allocation3 + $0xe1] sm:$0xff] %vm1296_vm5, %v1291_v32  ;;  %2710 = vmatmul.msk.f32.gmra.mxu2 %vm1296_vm5, %v4060_v41  ;;  %2745 = vmatmul.msk.f32.gmra.mxu0 %vm1296_vm5, %v4060_v41  ;;  %v1462_v35 = vrot.slane %v4060_v41, 1  ;;  %v1463_v24 = vrot.slane %v1382_v25, 1  ;;  %v1707_v37 = vrot.slane %v4060_v41, 2  ;;  %v1708_v51 = vrot.slane %v1382_v25, 2 }
 0x1d3   :  { %v1232_v61 = vpop.f32.mrf.mxu0 }
 0x1d4   :  { %v1256_v40 = vadd.f32 %v1232_v61, %v1160_v4  ;;  %v4076_v60 = vsel %vm269_vm3, %v1462_v35, %v1463_v24  ;;  %v4079_v56 = vsel %vm521_vm4, %v1707_v37, %v1708_v51  ;;  %v2787_v4 = vld [vmem:[%s4545_s3 + $0x60] sm:$0xff]  ;;  %v779_v37 = vadd.f32 %v3755_v44, %v687_v20  ;;  %v955_v47 = vpop.f32.mrf.mxu1  ;;  %v2805_v44 = vld [vmem:[%s4545_s3 + $0x70] sm:$0xff] }
 0x1d5   :  { %2694 = vmatmul.msk.f32.gmra.mxu1 %vm1296_vm5, %v4076_v60  ;;  %2728 = vmatmul.msk.f32.gmra.mxu3 %vm1296_vm5, %v4079_v56  ;;  %v1044_v55 = vpop.f32.mrf.mxu2 }
 0x1d6   :  { %v1276_v17 = vadd.f32 %v3820_v39, %v1256_v40  ;;  %2142 = vmatpush.msra.mxu3 %v2787_v4  ;;  %v1064_v51 = vadd.f32 %v1044_v55, %v972_v16  ;;  %v877_v61 = vadd.f32 %v3796_v15, %v779_v37  ;;  %2238 = vmatpush.msra.mxu0 %v2805_v44 }
 0x1d8   :  { %v1292_v14 = vmax.f32 %v1276_v17, 0.0  ;;  %v1142_v25 = vpop.f32.mrf.mxu3  ;;  %v973_v55 = vadd.f32 %v955_v47, %v877_v61 }
 0x1d9   :  { %v4093_v11 = vld [vmem:[#allocation3 + $0xe0] sm:$0xff]  ;;  %v1384_v21 = vld [vmem:[#allocation3 + $0xe8] sm:$0x3]  ;;  %v1162_v63 = vadd.f32 %v1142_v25, %v1064_v51 }
 0x1da   :  { %1351 = vst.msk [vmem:[#allocation3 + $0xf1] sm:$0xff] %vm1296_vm5, %v1292_v14  ;;  %2711 = vmatmul.msk.f32.gmra.mxu2 %vm1296_vm5, %v4093_v11  ;;  %2746 = vmatmul.msk.f32.gmra.mxu0 %vm1296_vm5, %v4093_v11  ;;  %v1465_v48 = vrot.slane %v4093_v11, 1  ;;  %v1466_v36 = vrot.slane %v1384_v21, 1  ;;  %v1710_v6 = vrot.slane %v4093_v11, 2  ;;  %v1711_v32 = vrot.slane %v1384_v21, 2 }
 0x1db   :  { %v1235_v43 = vpop.f32.mrf.mxu0 }
 0x1dc   :  { %v1257_v3 = vadd.f32 %v1235_v43, %v1161_v34  ;;  %v4109_v35 = vsel %vm269_vm3, %v1465_v48, %v1466_v36  ;;  %v4112_v24 = vsel %vm521_vm4, %v1710_v6, %v1711_v32 }
 0x1dd   :  { %2695 = vmatmul.msk.f32.gmra.mxu1 %vm1296_vm5, %v4109_v35  ;;  %2729 = vmatmul.msk.f32.gmra.mxu3 %vm1296_vm5, %v4112_v24  ;;  %v1047_v1 = vpop.f32.mrf.mxu2 }
 0x1de   :  { %v1277_v27 = vadd.f32 %v3820_v39, %v1257_v3  ;;  %v1065_v48 = vadd.f32 %v1047_v1, %v973_v55 }
 0x1e0   :  { %v1293_v40 = vmax.f32 %v1277_v27, 0.0  ;;  %v1145_v36 = vpop.f32.mrf.mxu3 }
 0x1e1   :  { %v4127_v0 = vld [vmem:[#allocation3 + $0xf0] sm:$0xff]  ;;  %v1386_v45 = vld [vmem:[#allocation3 + $0xf8] sm:$0x3]  ;;  %v1163_v28 = vadd.f32 %v1145_v36, %v1065_v48 }
 0x1e2   :  { %1352 = vst.msk [vmem:[#allocation3 + $0x101] sm:$0xff] %vm1296_vm5, %v1293_v40  ;;  %2712 = vmatmul.msk.f32.gmra.mxu2 %vm1296_vm5, %v4127_v0  ;;  %2747 = vmatmul.msk.f32.gmra.mxu0 %vm1296_vm5, %v4127_v0  ;;  %v1468_v15 = vrot.slane %v4127_v0, 1  ;;  %v1469_v17 = vrot.slane %v1386_v45, 1  ;;  %v1713_v62 = vrot.slane %v4127_v0, 2  ;;  %v1714_v14 = vrot.slane %v1386_v45, 2 }
 0x1e3   :  { %v1238_v26 = vpop.f32.mrf.mxu0 }
 0x1e4   :  { %v1258_v20 = vadd.f32 %v1238_v26, %v1162_v63  ;;  %v4137_v34 = vsel %vm269_vm3, %v1468_v15, %v1469_v17  ;;  %v4140_v21 = vsel %vm521_vm4, %v1713_v62, %v1714_v14  ;;  %v4186_v14 = vpop.f32.mrf.mxu1 }
 0x1e5   :  { %2696 = vmatmul.msk.f32.gmra.mxu1 %vm1296_vm5, %v4137_v34  ;;  %2730 = vmatmul.msk.f32.gmra.mxu3 %vm1296_vm5, %v4140_v21  ;;  %v4194_v26 = vpop.f32.mrf.mxu2 }
 0x1e6   :  { %v1278_v6 = vadd.f32 %v3820_v39, %v1258_v20 }
 0x1e8   :  { %v1294_v32 = vmax.f32 %v1278_v6, 0.0  ;;  %v4202_v48 = vpop.f32.mrf.mxu3 }
 0x1e9   :  { %v4147_v16 = vld [vmem:[#allocation3 + $0x100] sm:$0xff]  ;;  %v1388_v43 = vld [vmem:[#allocation3 + $0x108] sm:$0x3] }
 0x1ea   :  { %1353 = vst.msk [vmem:[#allocation3 + $0x111] sm:$0xff] %vm1296_vm5, %v1294_v32  ;;  %2713 = vmatmul.msk.f32.gmra.mxu2 %vm1296_vm5, %v4147_v16  ;;  %2748 = vmatmul.msk.f32.gmra.mxu0 %vm1296_vm5, %v4147_v16  ;;  %v1471_v4 = vrot.slane %v4147_v16, 1  ;;  %v1472_v25 = vrot.slane %v1388_v43, 1  ;;  %v1716_v3 = vrot.slane %v4147_v16, 2  ;;  %v1717_v37 = vrot.slane %v1388_v43, 2 }
 0x1eb   :  { %v1241_v51 = vpop.f32.mrf.mxu0 }
 0x1ec   :  { %v1259_v5 = vadd.f32 %v1241_v51, %v1163_v28  ;;  %v4157_v27 = vsel %vm269_vm3, %v1471_v4, %v1472_v25  ;;  %v4160_v61 = vsel %vm521_vm4, %v1716_v3, %v1717_v37 }
 0x1ed   :  { %2697 = vmatmul.msk.f32.gmra.mxu1 %vm1296_vm5, %v4157_v27  ;;  %2731 = vmatmul.msk.f32.gmra.mxu3 %vm1296_vm5, %v4160_v61 }
 0x1ee   :  { %v1279_v47 = vadd.f32 %v3820_v39, %v1259_v5 }
 0x1f0   :  { %v1295_v40 = vmax.f32 %v1279_v47, 0.0 }
 0x1f1   :  { %v4167_v44 = vld [vmem:[#allocation3 + $0x110] sm:$0xff]  ;;  %v1390_v63 = vld [vmem:[#allocation3 + $0x118] sm:$0x3] }
 0x1f2   :  { %1354 = vst.msk [vmem:[#allocation3 + $0x121] sm:$0xff] %vm1296_vm5, %v1295_v40  ;;  %2714 = vmatmul.msk.f32.gmra.mxu2 %vm1296_vm5, %v4167_v44  ;;  %2749 = vmatmul.msk.f32.gmra.mxu0 %vm1296_vm5, %v4167_v44  ;;  %v1474_v45 = vrot.slane %v4167_v44, 1  ;;  %v1475_v1 = vrot.slane %v1390_v63, 1  ;;  %v1719_v15 = vrot.slane %v4167_v44, 2  ;;  %v1720_v17 = vrot.slane %v1390_v63, 2 }
 0x1f4   :  { %v4177_v39 = vsel %vm269_vm3, %v1474_v45, %v1475_v1  ;;  %v4180_v62 = vsel %vm521_vm4, %v1719_v15, %v1720_v17 }
 0x1f5   :  { %2698 = vmatmul.msk.f32.gmra.mxu1 %vm1296_vm5, %v4177_v39  ;;  %2732 = vmatmul.msk.f32.gmra.mxu3 %vm1296_vm5, %v4180_v62 }
 0x1f9   :  { %v4188_v55 = vld [vmem:[#allocation3 + $0x120] sm:$0xff] }
 0x1fa   :  { %2750 = vmatmul.msk.f32.gmra.mxu0 %vm1296_vm5, %v4188_v55  ;;  %2771 = vmatmul.msk.f32.vlgmr.msra.gmra.mxu2 %vm1296_vm5, %v3848_v31 }
 0x1fd   :  { %2753 = vmatmul.msk.f32.vlgmr.msrb.gmra.mxu1 %vm1296_vm5, %v3845_v13  ;;  %2789 = vmatmul.msk.f32.vlgmr.msra.gmra.mxu3 %vm1296_vm5, %v3859_v19 }
 0x1ff   :  { %v4200_v20 = vpop.f32.mrf.mxu0 }
 0x202   :  { %v1532_v36 = vpop.f32.mrf.mxu1  ;;  %2772 = vmatmul.msk.f32.gmra.mxu2 %vm1296_vm5, %v3872_v10  ;;  %2807 = vmatmul.msk.f32.vlgmr.msra.gmra.mxu0 %vm1296_vm5, %v3869_v52 }
 0x205   :  { %v1629_v31 = vpop.f32.mrf.mxu2  ;;  %2754 = vmatmul.msk.f32.gmra.mxu1 %vm1296_vm5, %v3869_v52  ;;  %2790 = vmatmul.msk.f32.gmra.mxu3 %vm1296_vm5, %v3881_v30 }
 0x206   :  { %v1630_v13 = vadd.f32 %v1629_v31, %v1532_v36 }
 0x207   :  { %v1867_v19 = vpop.f32.mrf.mxu0 }
 0x208   :  { %v1777_v6 = vpop.f32.mrf.mxu3 }
 0x209   :  { %v1823_v32 = vadd.f32 %v1777_v6, %v1630_v13 }
 0x20a   :  { %v1535_v28 = vpop.f32.mrf.mxu1  ;;  %2773 = vmatmul.msk.f32.gmra.mxu2 %vm1296_vm5, %v3895_v38  ;;  %2808 = vmatmul.msk.f32.gmra.mxu0 %vm1296_vm5, %v3892_v59 }
 0x20b   :  { %v4216_v43 = vadd.f32 %v1867_v19, %v1823_v32 }
 0x20d   :  { %v1632_v4 = vpop.f32.mrf.mxu2  ;;  %2755 = vmatmul.msk.f32.gmra.mxu1 %vm1296_vm5, %v3892_v59  ;;  %2791 = vmatmul.msk.f32.gmra.mxu3 %vm1296_vm5, %v3904_v46 }
 0x20e   :  { %v1633_v52 = vadd.f32 %v1632_v4, %v1535_v28  ;;  %v1372_v4 = vld [vmem:[#allocation3 + $0x88] sm:$0x3] }
 0x20f   :  { %v1870_v30 = vpop.f32.mrf.mxu0 }
 0x210   :  { %v1780_v25 = vpop.f32.mrf.mxu3 }
 0x211   :  { %v1824_v3 = vadd.f32 %v1780_v25, %v1633_v52 }
 0x212   :  { %v1538_v37 = vpop.f32.mrf.mxu1  ;;  %2774 = vmatmul.msk.f32.gmra.mxu2 %vm1296_vm5, %v3918_v50  ;;  %2809 = vmatmul.msk.f32.gmra.mxu0 %vm1296_vm5, %v3915_v12 }
 0x213   :  { %v4226_v51 = vadd.f32 %v1870_v30, %v1824_v3  ;;  %v1930_v30 = vrot.slane %v4003_v2, 1  ;;  %v1931_v3 = vrot.slane %v1372_v4, 1 }
 0x215   :  { %v1635_v5 = vpop.f32.mrf.mxu2  ;;  %2756 = vmatmul.msk.f32.gmra.mxu1 %vm1296_vm5, %v3915_v12  ;;  %2792 = vmatmul.msk.f32.gmra.mxu3 %vm1296_vm5, %v3927_v9  ;;  %v2823_v9 = vld [vmem:[%s4545_s3 + $0x80] sm:$0xff] }
 0x216   :  { %v1636_v59 = vadd.f32 %v1635_v5, %v1538_v37  ;;  %2332 = vmatpush.msra.mxu1 %v2823_v9 }
 0x217   :  { %v1873_v46 = vpop.f32.mrf.mxu0 }
 0x218   :  { %v1783_v47 = vpop.f32.mrf.mxu3 }
 0x219   :  { %v1825_v40 = vadd.f32 %v1783_v47, %v1636_v59 }
 0x21a   :  { %v1541_v63 = vpop.f32.mrf.mxu1  ;;  %2775 = vmatmul.msk.f32.gmra.mxu2 %vm1296_vm5, %v3943_v54  ;;  %2810 = vmatmul.msk.f32.gmra.mxu0 %vm1296_vm5, %v3940_v29 }
 0x21b   :  { %v4236_v45 = vadd.f32 %v1873_v46, %v1825_v40  ;;  %v4267_v46 = vld [vmem:[#allocation3 + $0x98] sm:$0x3] }
 0x21d   :  { %v1638_v1 = vpop.f32.mrf.mxu2  ;;  %2757 = vmatmul.msk.f32.gmra.mxu1 %vm1296_vm5, %v3940_v29  ;;  %2793 = vmatmul.msk.f32.gmra.mxu3 %vm1296_vm5, %v3955_v57 }
 0x21e   :  { %v1639_v12 = vadd.f32 %v1638_v1, %v1541_v63  ;;  %v1932_v63 = vsel %vm269_vm3, %v1930_v30, %v1931_v3 }
 0x21f   :  { %v1876_v15 = vpop.f32.mrf.mxu0 }
 0x220   :  { %v1786_v17 = vpop.f32.mrf.mxu3 }
 0x221   :  { %v1826_v36 = vadd.f32 %v1786_v17, %v1639_v12  ;;  %v2211_v12 = vrot.slane %v4267_v46, 1 }
 0x222   :  { %v1544_v31 = vpop.f32.mrf.mxu1  ;;  %2776 = vmatmul.msk.f32.gmra.mxu2 %vm1296_vm5, %v3968_v42  ;;  %2811 = vmatmul.msk.f32.gmra.mxu0 %vm1296_vm5, %v3965_v49 }
 0x223   :  { %v4249_v29 = vadd.f32 %v1876_v15, %v1826_v36 }
 0x225   :  { %v1641_v13 = vpop.f32.mrf.mxu2  ;;  %2758 = vmatmul.msk.f32.gmra.mxu1 %vm1296_vm5, %v3965_v49  ;;  %2794 = vmatmul.msk.f32.gmra.mxu3 %vm1296_vm5, %v3979_v33  ;;  %v2024_v49 = vrot.slane %v4003_v2, 2  ;;  %v2025_v33 = vrot.slane %v1372_v4, 2 }
 0x226   :  { %v1642_v57 = vadd.f32 %v1641_v13, %v1544_v31 }
 0x227   :  { %v1879_v19 = vpop.f32.mrf.mxu0  ;;  %v4270_v40 = vsel %vm521_vm4, %v2024_v49, %v2025_v33 }
 0x228   :  { %v1789_v6 = vpop.f32.mrf.mxu3 }
 0x229   :  { %v1827_v32 = vadd.f32 %v1789_v6, %v1642_v57 }
 0x22a   :  { %v1547_v28 = vpop.f32.mrf.mxu1  ;;  %2777 = vmatmul.msk.f32.gmra.mxu2 %vm1296_vm5, %v3992_v58  ;;  %2812 = vmatmul.msk.f32.gmra.mxu0 %vm1296_vm5, %v3989_v53 }
 0x22b   :  { %v4259_v52 = vadd.f32 %v1879_v19, %v1827_v32 }
 0x22d   :  { %v1644_v25 = vpop.f32.mrf.mxu2  ;;  %2759 = vmatmul.msk.f32.gmra.mxu1 %vm1296_vm5, %v3989_v53  ;;  %2795 = vmatmul.msk.f32.gmra.mxu3 %vm1296_vm5, %v4003_v2  ;;  %v4276_v53 = vld [vmem:[#allocation3 + $0x90] sm:$0xff] }
 0x22e   :  { %v1645_v37 = vadd.f32 %v1644_v25, %v1547_v28  ;;  %v2210_v2 = vrot.slane %v4276_v53, 1 }
 0x22f   :  { %v1882_v5 = vpop.f32.mrf.mxu0 }
 0x230   :  { %v1792_v59 = vpop.f32.mrf.mxu3  ;;  %v2212_v31 = vsel %vm269_vm3, %v2210_v2, %v2211_v12 }
 0x231   :  { %v1828_v47 = vadd.f32 %v1792_v59, %v1645_v37 }
 0x232   :  { %v1550_v1 = vpop.f32.mrf.mxu1  ;;  %2778 = vmatmul.msk.f32.gmra.mxu2 %vm1296_vm5, %v4270_v40  ;;  %2813 = vmatmul.msk.f32.gmra.mxu0 %vm1296_vm5, %v1932_v63 }
 0x233   :  { %v4280_v9 = vadd.f32 %v1882_v5, %v1828_v47 }
 0x235   :  { %v1647_v15 = vpop.f32.mrf.mxu2  ;;  %2760 = vmatmul.msk.f32.gmra.mxu1 %vm1296_vm5, %v1932_v63  ;;  %2796 = vmatmul.msk.f32.gmra.mxu3 %vm1296_vm5, %v4276_v53 }
 0x236   :  { %v1648_v17 = vadd.f32 %v1647_v15, %v1550_v1 }
 0x237   :  { %v1885_v36 = vpop.f32.mrf.mxu0 }
 0x238   :  { %v1795_v13 = vpop.f32.mrf.mxu3 }
 0x239   :  { %v1829_v57 = vadd.f32 %v1795_v13, %v1648_v17 }
 0x23a   :  { %v1553_v19 = vpop.f32.mrf.mxu1  ;;  %2779 = vmatmul.msk.f32.gmra.mxu2 %vm1296_vm5, %v4025_v22  ;;  %2814 = vmatmul.msk.f32.gmra.mxu0 %vm1296_vm5, %v2212_v31 }
 0x23b   :  { %v4289_v6 = vadd.f32 %v1885_v36, %v1829_v57 }
 0x23d   :  { %v1650_v32 = vpop.f32.mrf.mxu2  ;;  %2761 = vmatmul.msk.f32.gmra.mxu1 %vm1296_vm5, %v4022_v23  ;;  %2797 = vmatmul.msk.f32.gmra.mxu3 %vm1296_vm5, %v4036_v8 }
 0x23e   :  { %v1651_v28 = vadd.f32 %v1650_v32, %v1553_v19 }
 0x23f   :  { %v1888_v4 = vpop.f32.mrf.mxu0 }
 0x240   :  { %v1798_v30 = vpop.f32.mrf.mxu3 }
 0x241   :  { %v1830_v49 = vadd.f32 %v1798_v30, %v1651_v28 }
 0x242   :  { %v1556_v25 = vpop.f32.mrf.mxu1  ;;  %2780 = vmatmul.msk.f32.gmra.mxu2 %vm1296_vm5, %v4049_v7  ;;  %2815 = vmatmul.msk.f32.gmra.mxu0 %vm1296_vm5, %v4046_v18 }
 0x243   :  { %v4299_v22 = vadd.f32 %v1888_v4, %v1830_v49 }
 0x245   :  { %v1653_v33 = vpop.f32.mrf.mxu2  ;;  %2762 = vmatmul.msk.f32.gmra.mxu1 %vm1296_vm5, %v4046_v18  ;;  %2798 = vmatmul.msk.f32.gmra.mxu3 %vm1296_vm5, %v4060_v41 }
 0x246   :  { %v1654_v23 = vadd.f32 %v1653_v33, %v1556_v25 }
 0x247   :  { %v1891_v8 = vpop.f32.mrf.mxu0 }
 0x248   :  { %v1801_v3 = vpop.f32.mrf.mxu3 }
 0x249   :  { %v1831_v37 = vadd.f32 %v1801_v3, %v1654_v23  ;;  %v1392_v23 = vld [vmem:[#allocation3 + $0x128] sm:$0x3]  ;;  %v1933_v3 = vrot.slane %v4188_v55, 1 }
 0x24a   :  { %v1559_v5 = vpop.f32.mrf.mxu1  ;;  %2781 = vmatmul.msk.f32.gmra.mxu2 %vm1296_vm5, %v4079_v56  ;;  %2816 = vmatmul.msk.f32.gmra.mxu0 %vm1296_vm5, %v4076_v60 }
 0x24b   :  { %v4309_v59 = vadd.f32 %v1891_v8, %v1831_v37 }
 0x24d   :  { %v1656_v47 = vpop.f32.mrf.mxu2  ;;  %2763 = vmatmul.msk.f32.gmra.mxu1 %vm1296_vm5, %v4076_v60  ;;  %2799 = vmatmul.msk.f32.gmra.mxu3 %vm1296_vm5, %v4093_v11 }
 0x24e   :  { %v1657_v18 = vadd.f32 %v1656_v47, %v1559_v5  ;;  %v1934_v5 = vrot.slane %v1392_v23, 1 }
 0x24f   :  { %v1894_v41 = vpop.f32.mrf.mxu0 }
 0x250   :  { %v1804_v63 = vpop.f32.mrf.mxu3 }
 0x251   :  { %v1832_v1 = vadd.f32 %v1804_v63, %v1657_v18  ;;  %v4357_v63 = vld [vmem:[#allocation3 + $0x138] sm:$0x3] }
 0x252   :  { %v1562_v2 = vpop.f32.mrf.mxu1  ;;  %2782 = vmatmul.msk.f32.gmra.mxu2 %vm1296_vm5, %v4112_v24  ;;  %2817 = vmatmul.msk.f32.gmra.mxu0 %vm1296_vm5, %v4109_v35 }
 0x253   :  { %v4319_v12 = vadd.f32 %v1894_v41, %v1832_v1  ;;  %v1627_v1 = vadd.f32 %v4194_v26, %v4186_v14 }
 0x255   :  { %v1659_v15 = vpop.f32.mrf.mxu2  ;;  %2764 = vmatmul.msk.f32.gmra.mxu1 %vm1296_vm5, %v4109_v35  ;;  %2800 = vmatmul.msk.f32.gmra.mxu3 %vm1296_vm5, %v4127_v0  ;;  %v1822_v14 = vadd.f32 %v4202_v48, %v1627_v1 }
 0x256   :  { %v1660_v60 = vadd.f32 %v1659_v15, %v1562_v2 }
 0x257   :  { %v1897_v11 = vpop.f32.mrf.mxu0 }
 0x258   :  { %v1807_v17 = vpop.f32.mrf.mxu3 }
 0x259   :  { %v1833_v36 = vadd.f32 %v1807_v17, %v1660_v60  ;;  %v1935_v60 = vsel %vm269_vm3, %v1933_v3, %v1934_v5  ;;  %v2214_v17 = vrot.slane %v4357_v63, 1 }
 0x25a   :  { %v1565_v31 = vpop.f32.mrf.mxu1  ;;  %2783 = vmatmul.msk.f32.gmra.mxu2 %vm1296_vm5, %v4140_v21  ;;  %2818 = vmatmul.msk.f32.gmra.mxu0 %vm1296_vm5, %v4137_v34 }
 0x25b   :  { %v4329_v13 = vadd.f32 %v1897_v11, %v1833_v36 }
 0x25d   :  { %v1662_v57 = vpop.f32.mrf.mxu2  ;;  %2765 = vmatmul.msk.f32.gmra.mxu1 %vm1296_vm5, %v4137_v34  ;;  %2801 = vmatmul.msk.f32.gmra.mxu3 %vm1296_vm5, %v4147_v16 }
 0x25e   :  { %v1663_v35 = vadd.f32 %v1662_v57, %v1565_v31 }
 0x25f   :  { %v1900_v0 = vpop.f32.mrf.mxu0 }
 0x260   :  { %v1810_v19 = vpop.f32.mrf.mxu3 }
 0x261   :  { %v1834_v32 = vadd.f32 %v1810_v19, %v1663_v35  ;;  %v1912_v19 = vadd.f32 %v4200_v20, %v1822_v14 }
 0x262   :  { %v1568_v28 = vpop.f32.mrf.mxu1  ;;  %2784 = vmatmul.msk.f32.gmra.mxu2 %vm1296_vm5, %v4160_v61  ;;  %2819 = vmatmul.msk.f32.gmra.mxu0 %vm1296_vm5, %v4157_v27 }
 0x263   :  { %v4339_v4 = vadd.f32 %v1900_v0, %v1834_v32 }
 0x265   :  { %v1665_v30 = vpop.f32.mrf.mxu2  ;;  %2766 = vmatmul.msk.f32.gmra.mxu1 %vm1296_vm5, %v4157_v27  ;;  %2802 = vmatmul.msk.f32.gmra.mxu3 %vm1296_vm5, %v4167_v44  ;;  %v2027_v27 = vrot.slane %v4188_v55, 2  ;;  %v2028_v44 = vrot.slane %v1392_v23, 2 }
 0x266   :  { %v1666_v34 = vadd.f32 %v1665_v30, %v1568_v28 }
 0x267   :  { %v1903_v16 = vpop.f32.mrf.mxu0  ;;  %v4362_v15 = vsel %vm521_vm4, %v2027_v27, %v2028_v44 }
 0x268   :  { %v1813_v49 = vpop.f32.mrf.mxu3 }
 0x269   :  { %v1835_v25 = vadd.f32 %v1813_v49, %v1666_v34 }
 0x26a   :  { %v1571_v33 = vpop.f32.mrf.mxu1  ;;  %2785 = vmatmul.msk.f32.gmra.mxu2 %vm1296_vm5, %v4180_v62  ;;  %2820 = vmatmul.msk.f32.gmra.mxu0 %vm1296_vm5, %v4177_v39 }
 0x26b   :  { %v4349_v8 = vadd.f32 %v1903_v16, %v1835_v25 }
 0x26d   :  { %v1668_v37 = vpop.f32.mrf.mxu2  ;;  %2767 = vmatmul.msk.f32.gmra.mxu1 %vm1296_vm5, %v4177_v39  ;;  %2803 = vmatmul.msk.f32.gmra.mxu3 %vm1296_vm5, %v4188_v55  ;;  %v4368_v55 = vld [vmem:[#allocation3 + $0x130] sm:$0xff] }
 0x26e   :  { %v1669_v47 = vadd.f32 %v1668_v37, %v1571_v33  ;;  %v2213_v11 = vrot.slane %v4368_v55, 1 }
 0x26f   :  { %v1906_v18 = vpop.f32.mrf.mxu0 }
 0x270   :  { %v1816_v41 = vpop.f32.mrf.mxu3  ;;  %v2215_v35 = vsel %vm269_vm3, %v2213_v11, %v2214_v17 }
 0x271   :  { %v1836_v2 = vadd.f32 %v1816_v41, %v1669_v47 }
 0x272   :  { %v1574_v39 = vpop.f32.mrf.mxu1  ;;  %2786 = vmatmul.msk.f32.gmra.mxu2 %vm1296_vm5, %v4362_v15  ;;  %2821 = vmatmul.msk.f32.gmra.mxu0 %vm1296_vm5, %v1935_v60 }
 0x273   :  { %v4372_v36 = vadd.f32 %v1906_v18, %v1836_v2 }
 0x275   :  { %v1671_v26 = vpop.f32.mrf.mxu2  ;;  %2768 = vmatmul.msk.f32.gmra.mxu1 %vm1296_vm5, %v1935_v60  ;;  %2804 = vmatmul.msk.f32.gmra.mxu3 %vm1296_vm5, %v4368_v55 }
 0x276   :  { %v1672_v31 = vadd.f32 %v1671_v26, %v1574_v39 }
 0x277   :  { %v1909_v57 = vpop.f32.mrf.mxu0 }
 0x278   :  { %v1819_v0 = vpop.f32.mrf.mxu3 }
 0x279   :  { %v1837_v32 = vadd.f32 %v1819_v0, %v1672_v31 }
 0x27a   :  { %v1960_v28 = vpop.f32.mrf.mxu1  ;;  %2822 = vmatmul.msk.f32.gmra.mxu0 %vm1296_vm5, %v2215_v35 }
 0x27b   :  { %v2008_v30 = vadd.f32 %v1960_v28, %v1912_v19  ;;  %v4381_v34 = vadd.f32 %v1909_v57, %v1837_v32 }
 0x27d   :  { %v2054_v48 = vpop.f32.mrf.mxu2  ;;  %2825 = vmatmul.msk.f32.vlgmr.msra.gmra.mxu1 %vm1296_vm5, %v3872_v10 }
 0x27e   :  { %v2102_v16 = vadd.f32 %v2054_v48, %v2008_v30 }
 0x27f   :  { %v2240_v49 = vpop.f32.mrf.mxu0 }
 0x280   :  { %v2144_v25 = vpop.f32.mrf.mxu3 }
 0x281   :  { %v2192_v33 = vadd.f32 %v2144_v25, %v2102_v16 }
 0x282   :  { %v1963_v23 = vpop.f32.mrf.mxu1 }
 0x283   :  { %v2009_v3 = vadd.f32 %v1963_v23, %v4216_v43  ;;  %v4386_v27 = vadd.f32 %v2240_v49, %v2192_v33 }
 0x285   :  { %v2057_v20 = vpop.f32.mrf.mxu2  ;;  %2826 = vmatmul.msk.f32.gmra.mxu1 %vm1296_vm5, %v3895_v38 }
 0x286   :  { %v2103_v37 = vadd.f32 %v2057_v20, %v2009_v3 }
 0x287   :  { %v2243_v44 = vpop.f32.mrf.mxu0 }
 0x288   :  { %v2147_v5 = vpop.f32.mrf.mxu3 }
 0x289   :  { %v2193_v47 = vadd.f32 %v2147_v5, %v2103_v37  ;;  %v2305_v5 = vrot.slane %v4267_v46, 2 }
 0x28a   :  { %v1966_v18 = vpop.f32.mrf.mxu1 }
 0x28b   :  { %v2010_v10 = vadd.f32 %v1966_v18, %v4226_v51  ;;  %v4391_v41 = vadd.f32 %v2243_v44, %v2193_v47 }
 0x28d   :  { %v2060_v1 = vpop.f32.mrf.mxu2  ;;  %2827 = vmatmul.msk.f32.gmra.mxu1 %vm1296_vm5, %v3918_v50 }
 0x28e   :  { %v2104_v43 = vadd.f32 %v2060_v1, %v2010_v10 }
 0x28f   :  { %v2246_v2 = vpop.f32.mrf.mxu0 }
 0x290   :  { %v2150_v60 = vpop.f32.mrf.mxu3 }
 0x291   :  { %v2194_v39 = vadd.f32 %v2150_v60, %v2104_v43 }
 0x292   :  { %v1969_v11 = vpop.f32.mrf.mxu1 }
 0x293   :  { %v2011_v38 = vadd.f32 %v1969_v11, %v4236_v45  ;;  %v4396_v17 = vadd.f32 %v2246_v2, %v2194_v39 }
 0x295   :  { %v2063_v14 = vpop.f32.mrf.mxu2  ;;  %2828 = vmatmul.msk.f32.gmra.mxu1 %vm1296_vm5, %v3943_v54 }
 0x296   :  { %v2105_v51 = vadd.f32 %v2063_v14, %v2011_v38 }
 0x297   :  { %v2249_v26 = vpop.f32.mrf.mxu0 }
 0x298   :  { %v2153_v31 = vpop.f32.mrf.mxu3 }
 0x299   :  { %v2195_v57 = vadd.f32 %v2153_v31, %v2105_v51 }
 0x29a   :  { %v1972_v35 = vpop.f32.mrf.mxu1 }
 0x29b   :  { %v2012_v50 = vadd.f32 %v1972_v35, %v4249_v29  ;;  %v4401_v0 = vadd.f32 %v2249_v26, %v2195_v57 }
 0x29d   :  { %v2066_v19 = vpop.f32.mrf.mxu2  ;;  %2829 = vmatmul.msk.f32.gmra.mxu1 %vm1296_vm5, %v3968_v42 }
 0x29e   :  { %v2106_v45 = vadd.f32 %v2066_v19, %v2012_v50  ;;  %v4473_v50 = vld [vmem:[%s4546_s4] ss:$0 sm:$0xff] }
 0x29f   :  { %v2252_v32 = vpop.f32.mrf.mxu0 }
 0x2a0   :  { %v2156_v28 = vpop.f32.mrf.mxu3 }
 0x2a1   :  { %v2196_v30 = vadd.f32 %v2156_v28, %v2106_v45 }
 0x2a2   :  { %v1975_v48 = vpop.f32.mrf.mxu1 }
 0x2a3   :  { %v2013_v54 = vadd.f32 %v1975_v48, %v4259_v52  ;;  %v4406_v16 = vadd.f32 %v2252_v32, %v2196_v30  ;;  %v2304_v52 = vrot.slane %v4276_v53, 2  ;;  %v2479_v48 = vld [vmem:[%s4547_s5 + $0x10] sm:$0xff] }
 0x2a5   :  { %v2069_v49 = vpop.f32.mrf.mxu2  ;;  %2830 = vmatmul.msk.f32.gmra.mxu1 %vm1296_vm5, %v3992_v58  ;;  %v2306_v1 = vsel %vm521_vm4, %v2304_v52, %v2305_v5 }
 0x2a6   :  { %v2107_v29 = vadd.f32 %v2069_v49, %v2013_v54 }
 0x2a7   :  { %v2255_v25 = vpop.f32.mrf.mxu0 }
 0x2a8   :  { %v2159_v33 = vpop.f32.mrf.mxu3 }
 0x2a9   :  { %v2197_v23 = vadd.f32 %v2159_v33, %v2107_v29 }
 0x2aa   :  { %v1978_v3 = vpop.f32.mrf.mxu1 }
 0x2ab   :  { %v2014_v42 = vadd.f32 %v1978_v3, %v4280_v9  ;;  %v4411_v20 = vadd.f32 %v2255_v25, %v2197_v23 }
 0x2ad   :  { %v2072_v37 = vpop.f32.mrf.mxu2  ;;  %2831 = vmatmul.msk.f32.gmra.mxu1 %vm1296_vm5, %v4270_v40 }
 0x2ae   :  { %v2108_v44 = vadd.f32 %v2072_v37, %v2014_v42 }
 0x2af   :  { %v2258_v47 = vpop.f32.mrf.mxu0 }
 0x2b0   :  { %v2162_v58 = vpop.f32.mrf.mxu3 }
 0x2b1   :  { %v2198_v18 = vadd.f32 %v2162_v58, %v2108_v44 }
 0x2b2   :  { %v1981_v10 = vpop.f32.mrf.mxu1 }
 0x2b3   :  { %v2015_v43 = vadd.f32 %v1981_v10, %v4289_v6  ;;  %v4419_v9 = vadd.f32 %v2258_v47, %v2198_v18 }
 0x2b5   :  { %v2075_v2 = vpop.f32.mrf.mxu2  ;;  %2832 = vmatmul.msk.f32.gmra.mxu1 %vm1296_vm5, %v2306_v1 }
 0x2b6   :  { %v2109_v60 = vadd.f32 %v2075_v2, %v2015_v43 }
 0x2b7   :  { %v2261_v53 = vpop.f32.mrf.mxu0 }
 0x2b8   :  { %v2165_v40 = vpop.f32.mrf.mxu3 }
 0x2b9   :  { %v2199_v39 = vadd.f32 %v2165_v40, %v2109_v60 }
 0x2ba   :  { %v1984_v11 = vpop.f32.mrf.mxu1 }
 0x2bb   :  { %v4423_v46 = vadd.f32 %v1984_v11, %v4299_v22  ;;  %v4425_v38 = vadd.f32 %v2261_v53, %v2199_v39 }
 0x2bd   :  { %2833 = vmatmul.msk.f32.gmra.mxu1 %vm1296_vm5, %v4049_v7  ;;  %v2078_v58 = vpop.f32.mrf.mxu2 }
 0x2bf   :  { %v2264_v40 = vpop.f32.mrf.mxu0 }
 0x2c2   :  { %v1987_v14 = vpop.f32.mrf.mxu1 }
 0x2c3   :  { %v4430_v6 = vadd.f32 %v1987_v14, %v4309_v59  ;;  %v2478_v14 = vld [vmem:[%s4547_s5 + $0x8] sm:$0xff] }
 0x2c5   :  { %2834 = vmatmul.msk.f32.gmra.mxu1 %vm1296_vm5, %v4079_v56  ;;  %v2081_v53 = vpop.f32.mrf.mxu2 }
 0x2ca   :  { %v1990_v51 = vpop.f32.mrf.mxu1 }
 0x2cb   :  { %v4435_v26 = vadd.f32 %v1990_v51, %v4319_v12 }
 0x2cd   :  { %2835 = vmatmul.msk.f32.gmra.mxu1 %vm1296_vm5, %v4112_v24 }
 0x2d2   :  { %v1993_v22 = vpop.f32.mrf.mxu1 }
 0x2d3   :  { %v4440_v31 = vadd.f32 %v1993_v22, %v4329_v13  ;;  %v2480_v13 = vld [vmem:[%s4547_s5 + $0x18] sm:$0xff] }
 0x2d4   :  { %2503 = vmatpush.msrb.mxu2 %v2480_v13 }
 0x2d5   :  { %2836 = vmatmul.msk.f32.gmra.mxu1 %vm1296_vm5, %v4140_v21 }
 0x2d6   :  { %2504 = vmatpush.msrb.mxu2 %v2479_v48 }
 0x2d8   :  { %2505 = vmatpush.msrb.mxu2 %v2478_v14 }
 0x2da   :  { %v1996_v7 = vpop.f32.mrf.mxu1 }
 0x2db   :  { %v4445_v59 = vadd.f32 %v1996_v7, %v4339_v4  ;;  %v2308_v4 = vrot.slane %v4357_v63, 2 }
 0x2dd   :  { %2837 = vmatmul.msk.f32.gmra.mxu1 %vm1296_vm5, %v4160_v61  ;;  %v2307_v61 = vrot.slane %v4368_v55, 2 }
 0x2df   :  { %v2309_v57 = vsel %vm521_vm4, %v2307_v61, %v2308_v4  ;;  %v2110_v61 = vadd.f32 %v2078_v58, %v4423_v46  ;;  %v2267_v4 = vpop.f32.mrf.mxu0 }
 0x2e2   :  { %v1999_v56 = vpop.f32.mrf.mxu1 }
 0x2e3   :  { %v4450_v12 = vadd.f32 %v1999_v56, %v4349_v8 }
 0x2e5   :  { %2838 = vmatmul.msk.f32.gmra.mxu1 %vm1296_vm5, %v4180_v62 }
 0x2ea   :  { %v2002_v24 = vpop.f32.mrf.mxu1 }
 0x2eb   :  { %v4458_v21 = vadd.f32 %v2002_v24, %v4372_v36 }
 0x2ed   :  { %2839 = vmatmul.msk.f32.gmra.mxu1 %vm1296_vm5, %v4362_v15 }
 0x2f2   :  { %v2005_v8 = vpop.f32.mrf.mxu1 }
 0x2f3   :  { %v4466_v62 = vadd.f32 %v2005_v8, %v4381_v34 }
 0x2f5   :  { %2840 = vmatmul.msk.f32.gmra.mxu1 %vm1296_vm5, %v2309_v57  ;;  %v2084_v57 = vpop.f32.mrf.mxu2 }
 0x2fa   :  { %v2334_v35 = vpop.f32.mrf.mxu1 }
 0x2fb   :  { %v2382_v36 = vadd.f32 %v2334_v35, %v4386_v27 }
 0x2fd   :  { %v2402_v15 = vadd.f32 %v4473_v50, %v2382_v36 }
 0x2ff   :  { %v2418_v19 = vmax.f32 %v2402_v15, 0.0 }
 0x301   :  { %v2435_v32 = vsel %vm2434_vm7, %v2418_v19, 0.0 }
 0x302   :  { %v2337_v55 = vpop.f32.mrf.mxu1 }
 0x303   :  { %v2383_v63 = vadd.f32 %v2337_v55, %v4391_v41  ;;  %v2111_v55 = vadd.f32 %v2081_v53, %v4430_v6 }
 0x305   :  { %v2403_v45 = vadd.f32 %v4473_v50, %v2383_v63 }
 0x307   :  { %v2419_v34 = vmax.f32 %v2403_v45, 0.0 }
 0x309   :  { %v2436_v28 = vsel %vm2434_vm7, %v2419_v34, 0.0 }
 0x30a   :  { %v2437_v27 = vadd.f32 %v2436_v28, %v2435_v32  ;;  %v2340_v30 = vpop.f32.mrf.mxu1  ;;  %v2270_v28 = vpop.f32.mrf.mxu0 }
 0x30b   :  { %v2384_v54 = vadd.f32 %v2340_v30, %v4396_v17 }
 0x30d   :  { %v2404_v41 = vadd.f32 %v4473_v50, %v2384_v54 }
 0x30f   :  { %v2420_v49 = vmax.f32 %v2404_v41, 0.0 }
 0x311   :  { %v2438_v29 = vsel %vm2434_vm7, %v2420_v49, 0.0 }
 0x312   :  { %v2439_v25 = vadd.f32 %v2438_v29, %v2437_v27  ;;  %v2343_v33 = vpop.f32.mrf.mxu1  ;;  %v2087_v27 = vpop.f32.mrf.mxu2 }
 0x313   :  { %v2385_v23 = vadd.f32 %v2343_v33, %v4401_v0  ;;  %v2168_v0 = vpop.f32.mrf.mxu3  ;;  %v2273_v33 = vpop.f32.mrf.mxu0 }
 0x314   :  { %v2200_v36 = vadd.f32 %v2168_v0, %v2110_v61 }
 0x315   :  { %v2405_v3 = vadd.f32 %v4473_v50, %v2385_v23 }
 0x316   :  { %v2296_v34 = vadd.f32 %v2264_v40, %v2200_v36 }
 0x317   :  { %v2421_v42 = vmax.f32 %v2405_v3, 0.0 }
 0x319   :  { %v2440_v37 = vsel %vm2434_vm7, %v2421_v42, 0.0  ;;  %v2113_v42 = vadd.f32 %v2087_v27, %v4440_v31 }
 0x31a   :  { %v2441_v52 = vadd.f32 %v2440_v37, %v2439_v25  ;;  %v2346_v44 = vpop.f32.mrf.mxu1  ;;  %v2090_v3 = vpop.f32.mrf.mxu2 }
 0x31b   :  { %v2386_v5 = vadd.f32 %v2346_v44, %v4406_v16  ;;  %v2114_v31 = vadd.f32 %v2090_v3, %v4445_v59 }
 0x31d   :  { %v2406_v17 = vadd.f32 %v4473_v50, %v2386_v5 }
 0x31f   :  { %v2422_v47 = vmax.f32 %v2406_v17, 0.0  ;;  %v2477_v17 = vld [vmem:[%s4547_s5] sm:$0xff] }
 0x320   :  { %2506 = vmatpush.msrb.mxu2 %v2477_v17 }
 0x321   :  { %v2442_v18 = vsel %vm2434_vm7, %v2422_v47, 0.0 }
 0x322   :  { %v2443_v10 = vadd.f32 %v2442_v18, %v2441_v52  ;;  %v2349_v1 = vpop.f32.mrf.mxu1 }
 0x323   :  { %v2387_v43 = vadd.f32 %v2349_v1, %v4411_v20  ;;  %v2171_v20 = vpop.f32.mrf.mxu3 }
 0x324   :  { %v2201_v32 = vadd.f32 %v2171_v20, %v2111_v55 }
 0x325   :  { %v2407_v2 = vadd.f32 %v4473_v50, %v2387_v43  ;;  %v2276_v43 = vpop.f32.mrf.mxu0 }
 0x326   :  { %v2297_v48 = vadd.f32 %v2267_v4, %v2201_v32 }
 0x327   :  { %v2423_v60 = vmax.f32 %v2407_v2, 0.0 }
 0x329   :  { %v2444_v39 = vsel %vm2434_vm7, %v2423_v60, 0.0  ;;  %v2093_v60 = vpop.f32.mrf.mxu2 }
 0x32a   :  { %v2445_v11 = vadd.f32 %v2444_v39, %v2443_v10  ;;  %v2352_v16 = vpop.f32.mrf.mxu1 }
 0x32b   :  { %v2388_v51 = vadd.f32 %v2352_v16, %v4419_v9  ;;  %v2174_v9 = vpop.f32.mrf.mxu3 }
 0x32d   :  { %v2408_v22 = vadd.f32 %v4473_v50, %v2388_v51 }
 0x32f   :  { %v2424_v7 = vmax.f32 %v2408_v22, 0.0  ;;  %v2115_v22 = vadd.f32 %v2093_v60, %v4450_v12 }
 0x331   :  { %v2446_v56 = vsel %vm2434_vm7, %v2424_v7, 0.0  ;;  %v2096_v61 = vpop.f32.mrf.mxu2 }
 0x332   :  { %v2447_v24 = vadd.f32 %v2446_v56, %v2445_v11  ;;  %v2355_v13 = vpop.f32.mrf.mxu1  ;;  %v2116_v36 = vadd.f32 %v2096_v61, %v4458_v21 }
 0x333   :  { %v2389_v8 = vadd.f32 %v2355_v13, %v4425_v38  ;;  %v2112_v38 = vadd.f32 %v2084_v57, %v4435_v26  ;;  %v2177_v54 = vpop.f32.mrf.mxu3  ;;  %v2279_v13 = vpop.f32.mrf.mxu0 }
 0x334   :  { %v2203_v18 = vadd.f32 %v2177_v54, %v2113_v42 }
 0x335   :  { %v2409_v35 = vadd.f32 %v4473_v50, %v2389_v8  ;;  %v2202_v29 = vadd.f32 %v2174_v9, %v2112_v38 }
 0x336   :  { %v2299_v2 = vadd.f32 %v2273_v33, %v2203_v18 }
 0x337   :  { %v2425_v15 = vmax.f32 %v2409_v35, 0.0  ;;  %v2298_v26 = vadd.f32 %v2270_v28, %v2202_v29 }
 0x339   :  { %v2448_v63 = vsel %vm2434_vm7, %v2425_v15, 0.0  ;;  %v2099_v28 = vpop.f32.mrf.mxu2 }
 0x33a   :  { %v4506_v19 = vadd.f32 %v2448_v63, %v2447_v24  ;;  %v2358_v45 = vpop.f32.mrf.mxu1  ;;  %v2117_v27 = vadd.f32 %v2099_v28, %v4466_v62 }
 0x33b   :  { %v2390_v46 = vadd.f32 %v2358_v45, %v2296_v34  ;;  %v2180_v58 = vpop.f32.mrf.mxu3  ;;  %v2282_v32 = vpop.f32.mrf.mxu0 }
 0x33c   :  { %v2204_v11 = vadd.f32 %v2180_v58, %v2114_v31  ;;  %v2450_v3 = vrot.slane %v4506_v19, 4 }
 0x33d   :  { %v2410_v30 = vadd.f32 %v4473_v50, %v2390_v46 }
 0x33e   :  { %v2300_v7 = vadd.f32 %v2276_v43, %v2204_v11 }
 0x33f   :  { %v2426_v6 = vmax.f32 %v2410_v30, 0.0 }
 0x341   :  { %v2456_v37 = vsel %vm2434_vm7, %v2426_v6, 0.0 }
 0x342   :  { %v2361_v41 = vpop.f32.mrf.mxu1 }
 0x343   :  { %v2391_v49 = vadd.f32 %v2361_v41, %v2297_v48  ;;  %v2183_v14 = vpop.f32.mrf.mxu3  ;;  %v2285_v6 = vpop.f32.mrf.mxu0 }
 0x344   :  { %v2205_v4 = vadd.f32 %v2183_v14, %v2115_v22 }
 0x345   :  { %v2411_v25 = vadd.f32 %v4473_v50, %v2391_v49 }
 0x346   :  { %v2301_v9 = vadd.f32 %v2279_v13, %v2205_v4 }
 0x347   :  { %v2427_v23 = vmax.f32 %v2411_v25, 0.0 }
 0x349   :  { %v2457_v52 = vsel %vm2434_vm7, %v2427_v23, 0.0 }
 0x34a   :  { %v2458_v44 = vadd.f32 %v2457_v52, %v2456_v37  ;;  %v2364_v5 = vpop.f32.mrf.mxu1 }
 0x34b   :  { %v2392_v47 = vadd.f32 %v2364_v5, %v2298_v26  ;;  %v2186_v35 = vpop.f32.mrf.mxu3  ;;  %v2451_v26 = vadd.f32 %v2450_v3, %v4506_v19 }
 0x34c   :  { %v2206_v45 = vadd.f32 %v2186_v35, %v2116_v36 }
 0x34d   :  { %v2412_v10 = vadd.f32 %v4473_v50, %v2392_v47  ;;  %v2452_v17 = vrot.slane %v2451_v26, 2 }
 0x34e   :  { %v2302_v30 = vadd.f32 %v2282_v32, %v2206_v45 }
 0x34f   :  { %v2428_v1 = vmax.f32 %v2412_v10, 0.0  ;;  %v2453_v18 = vadd.f32 %v2452_v17, %v2451_v26 }
 0x351   :  { %v2459_v0 = vsel %vm2434_vm7, %v2428_v1, 0.0  ;;  %v2454_v31 = vrot.slane %v2453_v18, 1 }
 0x352   :  { %v2460_v40 = vadd.f32 %v2459_v0, %v2458_v44  ;;  %v2367_v39 = vpop.f32.mrf.mxu1 }
 0x353   :  { %v2393_v53 = vadd.f32 %v2367_v39, %v2299_v2  ;;  %v2189_v48 = vpop.f32.mrf.mxu3  ;;  %v2455_v2 = vadd.f32 %v2454_v31, %v2453_v18 }
 0x354   :  { %v2207_v49 = vadd.f32 %v2189_v48, %v2117_v27 }
 0x355   :  { %v2413_v16 = vadd.f32 %v4473_v50, %v2393_v53 }
 0x356   :  { %v2303_v33 = vadd.f32 %v2285_v6, %v2207_v49 }
 0x357   :  { %v2429_v51 = vmax.f32 %v2413_v16, 0.0 }
 0x359   :  { %v2461_v20 = vsel %vm2434_vm7, %v2429_v51, 0.0 }
 0x35a   :  { %v2462_v56 = vadd.f32 %v2461_v20, %v2460_v40  ;;  %v2370_v59 = vpop.f32.mrf.mxu1 }
 0x35b   :  { %v2394_v24 = vadd.f32 %v2370_v59, %v2300_v7 }
 0x35d   :  { %v2414_v8 = vadd.f32 %v4473_v50, %v2394_v24 }
 0x35f   :  { %v2430_v57 = vmax.f32 %v2414_v8, 0.0 }
 0x361   :  { %v2463_v15 = vsel %vm2434_vm7, %v2430_v57, 0.0 }
 0x362   :  { %v2464_v55 = vadd.f32 %v2463_v15, %v2462_v56  ;;  %v2373_v12 = vpop.f32.mrf.mxu1 }
 0x363   :  { %v2395_v63 = vadd.f32 %v2373_v12, %v2301_v9 }
 0x365   :  { %v2415_v34 = vadd.f32 %v4473_v50, %v2395_v63 }
 0x367   :  { %v2431_v46 = vmax.f32 %v2415_v34, 0.0 }
 0x369   :  { %v2465_v38 = vsel %vm2434_vm7, %v2431_v46, 0.0 }
 0x36a   :  { %v2466_v54 = vadd.f32 %v2465_v38, %v2464_v55  ;;  %v2376_v21 = vpop.f32.mrf.mxu1 }
 0x36b   :  { %v2396_v41 = vadd.f32 %v2376_v21, %v2302_v30 }
 0x36d   :  { %v2416_v29 = vadd.f32 %v4473_v50, %v2396_v41 }
 0x36f   :  { %v2432_v25 = vmax.f32 %v2416_v29, 0.0 }
 0x371   :  { %v2467_v23 = vsel %vm2434_vm7, %v2432_v25, 0.0 }
 0x372   :  { %v2468_v42 = vadd.f32 %v2467_v23, %v2466_v54  ;;  %v2379_v37 = vpop.f32.mrf.mxu1 }
 0x373   :  { %v2397_v62 = vadd.f32 %v2379_v37, %v2303_v33 }
 0x375   :  { %v2417_v52 = vadd.f32 %v4473_v50, %v2397_v62  ;;  %v2847_v50 = vld [vmem:[%s4548_s6] ss:$0 sm:$0xff] }
 0x377   :  { %v2433_v44 = vmax.f32 %v2417_v52, 0.0 }
 0x379   :  { %v2469_v5 = vsel %vm2434_vm7, %v2433_v44, 0.0 }
 0x37a   :  { %v2470_v47 = vadd.f32 %v2469_v5, %v2468_v42 }
 0x37c   :  { %v2471_v58 = vrot.slane %v2470_v47, 4 }
 0x37e   :  { %v2472_v10 = vadd.f32 %v2471_v58, %v2470_v47 }
 0x380   :  { %v2473_v1 = vrot.slane %v2472_v10, 2 }
 0x382   :  { %v2474_v43 = vadd.f32 %v2473_v1, %v2472_v10 }
 0x384   :  { %v2475_v0 = vrot.slane %v2474_v43, 1 }
 0x386   :  { %v2476_v60 = vadd.f32 %v2475_v0, %v2474_v43 }
 0x388   :  { %v2488_v40 = vsel %vm2487_vm8, %v2476_v60, %v2455_v2 }
 0x389   :  { %2841 = vmatmul.msk.f32.vlgmr.msrb.gmra.mxu2 %vm2434_vm7, %v2488_v40 }
 0x40c   :  { %v2508_v19 = vpop.f32.mrf.mxu2 }
 0x40d   :  { %v2509_v39 = vadd.f32 %v2847_v50, %v2508_v19 }
 0x40f   :  { %2511 = vst [vmem:[%s4549_s7] sm:$0x3] %v2509_v39 }

</bundles_post_ra>
